<compile_context>
chip_gen: v5e
topology: v5e:2x2
jax: 0.10.0
libtpu: 0.0.40
codegen_flags: <defaults>
</compile_context>

<pallas_src>
import functools

import jax
import jax.numpy as jnp
from jax.experimental import pallas as pl
from jax.experimental.pallas import tpu as pltpu


# Cast the (large) output2vocab matmul operands to bf16 (f32 MXU accumulation).
# Recurrent state / gate math stays in f32.
O2V_BF16 = True
_VMEM_LIMIT = 64 * 1024 * 1024


def _round_up(x, m):
    return ((x + m - 1) // m) * m


def _fs(shape):
    """Full-array BlockSpec for grid=(1,)."""
    nd = len(shape)
    return pl.BlockSpec(shape, lambda i: (0,) * nd)


# =============================================================================
# Tiled matmul kernel (vocab projection, GEN hoisted input projection).
# Grid over (M tiles, N tiles); K (= hidden size) is kept whole.
# =============================================================================
def _matmul_kernel(x_ref, w_ref, o_ref):
    o_ref[...] = jnp.dot(x_ref[...], w_ref[...],
                         preferred_element_type=jnp.float32).astype(o_ref.dtype)


def linear_tiled(x, w, *, tm=256, tn=512, cast_bf16=False):
    """y = x @ w with x:(M,K), w:(K,N).  M/N tiled, K whole.
    # TODO(synk): add a K grid axis + VMEM accumulator for very large K."""
    M, K = x.shape
    N = w.shape[1]
    if cast_bf16:
        x = x.astype(jnp.bfloat16)
        w = w.astype(jnp.bfloat16)
    tm = min(tm, _round_up(M, 8))
    tn = min(tn, _round_up(N, 128))
    Mp = _round_up(M, tm)
    Np = _round_up(N, tn)
    if Mp != M:
        x = jnp.pad(x, ((0, Mp - M), (0, 0)))
    if Np != N:
        w = jnp.pad(w, ((0, 0), (0, Np - N)))
    out = pl.pallas_call(
        _matmul_kernel,
        grid=(Mp // tm, Np // tn),
        out_shape=jax.ShapeDtypeStruct((Mp, Np), jnp.float32),
        in_specs=[pl.BlockSpec((tm, K), lambda i, j: (i, 0)),
                  pl.BlockSpec((K, tn), lambda i, j: (0, j))],
        out_specs=pl.BlockSpec((tm, tn), lambda i, j: (i, j)),
        compiler_params=pltpu.CompilerParams(
            dimension_semantics=("parallel", "parallel")),
    )(x, w)
    if Mp != M or Np != N:
        out = out[:M, :N]
    return out


# =============================================================================
# Fused bidirectional-GRU encoder (+ hidden2latent).  grid=(2,) runs the user-
# and item-encoder instances (params stacked on axis 0), marked "parallel".
# Only the (S, L) latent is written out; the full sequence never hits HBM.
# Forward and backward directions run as two sequential phases sharing one set
# of per-gate scratches (halves peak VMEM vs. a fused fwd/bwd loop).
# =============================================================================
def _bigru_encoder_kernel(x_len_ref, emb_ref,
                          f_wih_ref, f_whh_ref, f_bih_ref, f_bhh_ref,
                          b_wih_ref, b_whh_ref, b_bih_ref, b_bhh_ref,
                          h2l_f_ref, h2l_b_ref, h2l_bias_ref,
                          lat_ref,
                          gi_r, gi_z, gi_n, h_scr, lastf_scr, lastb_scr,
                          *, hidden_size):
    S, N, E = emb_ref.shape
    H = hidden_size
    emb2d = emb_ref[...].reshape(S * N, E)   # N is a multiple of 8 (layout-safe)
    rows = jax.lax.broadcasted_iota(jnp.int32, (N, 1), 0)

    def project(wih_ref, bih_ref):
        # Hoisted per-gate input projections: one big matmul each (fills MXU).
        for g, gi in enumerate((gi_r, gi_z, gi_n)):
            gi[...] = (jnp.dot(emb2d, wih_ref[g],
                               preferred_element_type=jnp.float32)
                       + bih_ref[g]).reshape(S, N, H)

    def run_direction(whh_ref, bhh_ref, last_scr, reverse):
        wr, wz, wn = whh_ref[0], whh_ref[1], whh_ref[2]
        br, bz, bn = bhh_ref[0], bhh_ref[1], bhh_ref[2]
        h_scr[...] = jnp.zeros_like(h_scr)

        def step(i, carry):
            t = (S - 1 - i) if reverse else i
            h = h_scr[...]
            ghr = jnp.dot(h, wr, preferred_element_type=jnp.float32) + br
            ghz = jnp.dot(h, wz, preferred_element_type=jnp.float32) + bz
            ghn = jnp.dot(h, wn, preferred_element_type=jnp.float32) + bn
            r = jax.nn.sigmoid(gi_r[t] + ghr)
            z = jax.nn.sigmoid(gi_z[t] + ghz)
            n = jnp.tanh(gi_n[t] + r * ghn)
            h_new = (1.0 - z) * n + z * h
            h_scr[...] = h_new
            # reference: encoder_outputs[t, x_len[t]-1, :] (masked row select)
            sel = rows == (x_len_ref[t] - 1)
            last_scr[pl.ds(t, 1), :] = jnp.sum(
                jnp.where(sel, h_new, 0.0), axis=0, keepdims=True)
            return carry

        jax.lax.fori_loop(0, S, step, 0, unroll=True)

    project(f_wih_ref, f_bih_ref)
    run_direction(f_whh_ref, f_bhh_ref, lastf_scr, reverse=False)
    project(b_wih_ref, b_bih_ref)
    run_direction(b_whh_ref, b_bhh_ref, lastb_scr, reverse=True)

    # fused hidden2latent: [last_fwd, last_bwd] @ W + b (weights pre-split).
    lat_ref[...] = (jnp.dot(lastf_scr[...], h2l_f_ref[...],
                            preferred_element_type=jnp.float32)
                    + jnp.dot(lastb_scr[...], h2l_b_ref[...],
                              preferred_element_type=jnp.float32)
                    + h2l_bias_ref[...])


def bigru_encoder_pair(enc_stacked, emb, x_len):
    """Runs the user & item encoders (params stacked on axis 0) in one call.
    emb: (S, N, E) with the reference's seq-first semantics.  -> (2, S, L)."""
    S, N, E = emb.shape
    H = enc_stacked["f"]["whh"].shape[-1]
    L = enc_stacked["h2l_b"].shape[-1]
    kern = functools.partial(_bigru_encoder_kernel, hidden_size=H)

    def stk(shape):
        nd = len(shape)
        return pl.BlockSpec((None,) + shape, lambda i: (i,) + (0,) * nd)

    def shared(shape):
        nd = len(shape)
        return pl.BlockSpec(shape, lambda i: (0,) * nd)

    return pl.pallas_call(
        kern,
        grid=(2,),
        out_shape=jax.ShapeDtypeStruct((2, S, L), jnp.float32),
        in_specs=[pl.BlockSpec(memory_space=pltpu.MemorySpace.SMEM),   # x_len
                  shared((S, N, E)),
                  stk((3, E, H)), stk((3, H, H)), stk((3, 1, H)), stk((3, 1, H)),
                  stk((3, E, H)), stk((3, H, H)), stk((3, 1, H)), stk((3, 1, H)),
                  stk((H, L)), stk((H, L)), stk((1, L))],
        out_specs=stk((S, L)),
        scratch_shapes=([pltpu.VMEM((S, N, H), jnp.float32) for _ in range(3)]
                        + [pltpu.VMEM((N, H), jnp.float32)]
                        + [pltpu.VMEM((S, H), jnp.float32) for _ in range(2)]),
        compiler_params=pltpu.CompilerParams(
            dimension_semantics=("parallel",),
            vmem_limit_bytes=_VMEM_LIMIT),
    )(x_len, emb,
      enc_stacked["f"]["wih"], enc_stacked["f"]["whh"],
      enc_stacked["f"]["bih"], enc_stacked["f"]["bhh"],
      enc_stacked["b"]["wih"], enc_stacked["b"]["whh"],
      enc_stacked["b"]["bih"], enc_stacked["b"]["bhh"],
      enc_stacked["h2l_f_wt"], enc_stacked["h2l_b_wt"], enc_stacked["h2l_b"])


# =============================================================================
# Decoder GRU kernel (user & item decoders stacked, grid=(2,), "parallel").
# latent2output(+tanh) is fused; the input projection is hoisted per-gate.
# =============================================================================
def _dec_gru_kernel(emb_ref, lat_ref, l2o_wt_ref, l2o_b_ref,
                    wih_ref, whh_ref, bih_ref, bhh_ref,
                    out_ref,
                    gi_r, gi_z, gi_n, dh_r, dh_z, dh_n, h_scr, *, hidden_size):
    S, N, E = emb_ref.shape
    H = hidden_size
    emb2d = emb_ref[...].reshape(S * N, E)
    # de_hidden = latent2output(tanh(latent))  (S, E)
    dh = (jnp.dot(jnp.tanh(lat_ref[...]), l2o_wt_ref[...],
                  preferred_element_type=jnp.float32) + l2o_b_ref[...])

    # Hoisted per-gate input projections; the de_hidden contribution is kept
    # in its own small (S, H) scratch so only lane-dense (1,H) broadcasts are
    # needed inside the loop (no rank-3 broadcast, no gate slicing).
    for g, (gi, dhg) in enumerate(((gi_r, dh_r), (gi_z, dh_z), (gi_n, dh_n))):
        w = wih_ref[g]
        gi[...] = (jnp.dot(emb2d, w, preferred_element_type=jnp.float32)
                   + bih_ref[g]).reshape(S, N, H)
        dhg[...] = jnp.dot(dh, w, preferred_element_type=jnp.float32)

    h_scr[...] = jnp.zeros_like(h_scr)
    wr, wz, wn = whh_ref[0], whh_ref[1], whh_ref[2]
    br, bz, bn = bhh_ref[0], bhh_ref[1], bhh_ref[2]

    def step(t, carry):
        h = h_scr[...]
        ghr = jnp.dot(h, wr, preferred_element_type=jnp.float32) + br
        ghz = jnp.dot(h, wz, preferred_element_type=jnp.float32) + bz
        ghn = jnp.dot(h, wn, preferred_element_type=jnp.float32) + bn
        r = jax.nn.sigmoid(gi_r[t] + dh_r[pl.ds(t, 1), :] + ghr)
        z = jax.nn.sigmoid(gi_z[t] + dh_z[pl.ds(t, 1), :] + ghz)
        n = jnp.tanh(gi_n[t] + dh_n[pl.ds(t, 1), :] + r * ghn)
        h_new = (1.0 - z) * n + z * h
        h_scr[...] = h_new
        out_ref[t] = h_new
        return carry

    jax.lax.fori_loop(0, S, step, 0, unroll=True)


def gru_decoder_pair(dec_stacked, emb, latents):
    """user & item decoders (stacked) in one pallas_call -> (2, S, N, H)."""
    S, N, E = emb.shape
    H = dec_stacked["whh"].shape[-1]
    L = latents.shape[-1]
    kern = functools.partial(_dec_gru_kernel, hidden_size=H)

    def stk(shape):
        nd = len(shape)
        return pl.BlockSpec((None,) + shape, lambda i: (i,) + (0,) * nd)

    def shared(shape):
        nd = len(shape)
        return pl.BlockSpec(shape, lambda i: (0,) * nd)

    return pl.pallas_call(
        kern,
        grid=(2,),
        out_shape=jax.ShapeDtypeStruct((2, S, N, H), jnp.float32),
        in_specs=[shared((S, N, E)),
                  stk((S, L)), stk((L, E)), stk((1, E)),
                  stk((3, E, H)), stk((3, H, H)), stk((3, 1, H)), stk((3, 1, H))],
        out_specs=stk((S, N, H)),
        scratch_shapes=([pltpu.VMEM((S, N, H), jnp.float32) for _ in range(3)]
                        + [pltpu.VMEM((S, H), jnp.float32) for _ in range(3)]
                        + [pltpu.VMEM((N, H), jnp.float32)]),
        compiler_params=pltpu.CompilerParams(
            dimension_semantics=("parallel",),
            vmem_limit_bytes=_VMEM_LIMIT),
    )(emb, latents, dec_stacked["l2o_wt"], dec_stacked["l2o_b"],
      dec_stacked["wih"], dec_stacked["whh"], dec_stacked["bih"],
      dec_stacked["bhh"])


# =============================================================================
# Vector quantization (nearest cluster, quantized vector, commitment diff).
# =============================================================================
def _vq_kernel(h_ref, e_ref, q_ref, diff_ref, *, commitment):
    h = h_ref[...]                                          # (B, L)
    e = e_ref[...]                                          # (L, C)
    h_sum = jnp.sum(h * h, axis=1, keepdims=True)
    e_sum = jnp.sum(e * e, axis=0, keepdims=True)
    dist = h_sum - 2.0 * jnp.dot(h, e, preferred_element_type=jnp.float32) + e_sum
    C = dist.shape[1]
    col = jax.lax.broadcasted_iota(jnp.int32, dist.shape, 1)
    min_d = jnp.min(dist, axis=1, keepdims=True)
    ind = jnp.min(jnp.where(dist <= min_d, col, C), axis=1, keepdims=True)
    onehot = (col == ind).astype(jnp.float32)               # (B, C)
    # q = onehot @ e.T without materializing e.T (contract the cluster axis).
    q = jax.lax.dot_general(onehot, e, (((1,), (1,)), ((), ())),
                            preferred_element_type=jnp.float32)
    q_ref[...] = q
    d = h - q
    total = jnp.sum(jnp.sum(d * d, axis=1, keepdims=True), axis=0, keepdims=True)
    diff_ref[...] = (commitment / float(d.shape[0] * d.shape[1])) * total


def vq_quantize(h, e, commitment):
    B, L = h.shape
    C = e.shape[1]
    kern = functools.partial(_vq_kernel, commitment=commitment)
    q, diff = pl.pallas_call(
        kern,
        grid=(1,),
        out_shape=(jax.ShapeDtypeStruct((B, L), jnp.float32),
                   jax.ShapeDtypeStruct((1, 1), jnp.float32)),
        in_specs=[_fs((B, L)), _fs((L, C))],
        out_specs=(_fs((B, L)), _fs((1, 1))),
    )(h, e)
    return q, diff[0, 0]


# =============================================================================
# _GEN_NETWORK decode loop: GRU cell + user/item attention, with the
# latent2output linear algebraically folded into the GRU input weights and the
# embedding input projection precomputed (hoisted) outside the loop.
# =============================================================================
def _gen_decode_kernel(gi_r_ref, gi_z_ref, gi_n_ref, prob_ref, uemb_ref,
                       item_ref, whh_ref, fw_ref, fb_ref, bhh_ref,
                       attn_wt_ref, attn_b_ref,
                       out_ref, h_scr, uih_scr, *, hidden_size):
    T, _B, _H = gi_r_ref.shape
    prob = prob_ref[...]                                    # (B, C)
    uemb = uemb_ref[...]                                    # (L, C)
    item = item_ref[...]                                    # (B, L)
    wr, wz, wn = whh_ref[0], whh_ref[1], whh_ref[2]
    br, bz, bn = bhh_ref[0], bhh_ref[1], bhh_ref[2]
    fwr, fwz, fwn = fw_ref[0], fw_ref[1], fw_ref[2]
    fbr, fbz, fbn = fb_ref[0], fb_ref[1], fb_ref[2]
    attn_wt = attn_wt_ref[...]
    attn_b = attn_b_ref[...]

    # uih_0 = user_cluster_prob @ user_embedding.T + item_embedding   (B, L)
    uih_scr[...] = jax.lax.dot_general(
        prob, uemb, (((1,), (1,)), ((), ())),
        preferred_element_type=jnp.float32) + item
    h_scr[...] = jnp.zeros_like(h_scr)

    def step(t, carry):
        h = h_scr[...]
        uih = uih_scr[...]
        # x_t @ Wih = emb_gi[t] + uih @ (l2o_w @ Wih) + (l2o_b @ Wih + b_ih)
        gir = gi_r_ref[t] + jnp.dot(uih, fwr, preferred_element_type=jnp.float32) + fbr
        giz = gi_z_ref[t] + jnp.dot(uih, fwz, preferred_element_type=jnp.float32) + fbz
        gin = gi_n_ref[t] + jnp.dot(uih, fwn, preferred_element_type=jnp.float32) + fbn
        ghr = jnp.dot(h, wr, preferred_element_type=jnp.float32) + br
        ghz = jnp.dot(h, wz, preferred_element_type=jnp.float32) + bz
        ghn = jnp.dot(h, wn, preferred_element_type=jnp.float32) + bn
        r = jax.nn.sigmoid(gir + ghr)
        z = jax.nn.sigmoid(giz + ghz)
        n = jnp.tanh(gin + r * ghn)
        h_new = (1.0 - z) * n + z * h
        h_scr[...] = h_new
        out_ref[t] = h_new

        @pl.when(t + 1 < T)        # the last step's attention output is unused
        def _():
            a = jnp.dot(h_new, attn_wt, preferred_element_type=jnp.float32) + attn_b
            user_score = jnp.dot(a, uemb, preferred_element_type=jnp.float32) * prob
            item_score = jnp.sum(a * item, axis=-1, keepdims=True)
            m = jnp.maximum(jnp.max(user_score, axis=-1, keepdims=True), item_score)
            eu = jnp.exp(user_score - m)
            ei = jnp.exp(item_score - m)
            denom = jnp.sum(eu, axis=-1, keepdims=True) + ei
            au = eu / denom
            ai = ei / denom
            uih_new = jax.lax.dot_general(
                au * prob, uemb, (((1,), (1,)), ((), ())),
                preferred_element_type=jnp.float32) + ai * item
            uih_scr[...] = uih_new
        return carry

    jax.lax.fori_loop(0, T, step, 0, unroll=True)


# =============================================================================
# model pieces (glue: embedding lookups, parameter plumbing)
# =============================================================================
def encode(params, reviews, review_lens, user_ids, item_ids):
    """_ENC_NETWORK.forward (eval mode)."""
    emb = params["embedding"][reviews]                      # (B, T, E)
    B, T, _ = emb.shape

    # user & item encoders stacked -> one pallas_call, grid=(2,) "parallel"
    enc_stacked = jax.tree_util.tree_map(lambda a, b: jnp.stack([a, b]),
                                         params["user_enc"], params["item_enc"])
    latents = bigru_encoder_pair(enc_stacked, emb, review_lens)   # (2, B, L)
    user_hidden, item_hidden = latents[0], latents[1]

    user_quantize, quantize_diff = vq_quantize(
        user_hidden, params["user_embedding"], params["commitment"])

    # user & item decoders stacked -> one pallas_call, grid=(2,) "parallel"
    dec_stacked = jax.tree_util.tree_map(lambda a, b: jnp.stack([a, b]),
                                         params["user_dec"], params["item_dec"])
    dec_latents = jnp.stack([user_quantize, item_hidden])   # (2, B, L)
    outs = gru_decoder_pair(dec_stacked, emb, dec_latents)  # (2, B, T, H)
    H = outs.shape[-1]

    # single fused vocab projection for user+item (o2v weight DMA'd once)
    logits = linear_tiled(outs.reshape(2 * B * T, H), params["o2v_wt"],
                          cast_bf16=O2V_BF16)
    user_logits = logits[:B * T]
    item_logits = logits[B * T:]
    return user_logits, item_logits, quantize_diff


def decode(params, reviews, user_ids, item_ids, random_flag):
    """_GEN_NETWORK.forward (de_strategy='attn', eval mode)."""
    g = params["gen"]
    emb = params["embedding"][reviews]                      # (B, T, E)
    prob = params["user_cluster_prob"][user_ids]            # (B, C)
    item_h = params["item_embedding"][item_ids]             # (B, L)
    uemb = params["user_embedding"]                         # (L, C)
    B, T, E = emb.shape
    H = g["whh"].shape[-1]
    L = uemb.shape[0]
    C = prob.shape[1]

    # Hoisted GRU input projection: one big (B*T, E) @ (E, 3H) Pallas matmul,
    # split into lane-dense per-gate (T, B, H) tensors at the JAX level.
    wih_cat = jnp.concatenate([g["wih"][0], g["wih"][1], g["wih"][2]], axis=1)
    gi_all = linear_tiled(emb.reshape(B * T, E), wih_cat)   # (B*T, 3H), no bias
    gi_all = gi_all.reshape(B, T, 3 * H).transpose(1, 0, 2)  # (T, B, 3H)
    gi_r = gi_all[..., 0:H]
    gi_z = gi_all[..., H:2 * H]
    gi_n = gi_all[..., 2 * H:3 * H]

    # Fold latent2output into the GRU input weights (tiny host-side matmuls).
    fw = jnp.einsum("le,geh->glh", g["l2o_wt"], g["wih"])           # (3, L, H)
    fb = jnp.einsum("oe,geh->goh", g["l2o_b"], g["wih"]) + g["bih"]  # (3, 1, H)

    kern = functools.partial(_gen_decode_kernel, hidden_size=H)
    out = pl.pallas_call(
        kern,
        grid=(1,),
        out_shape=jax.ShapeDtypeStruct((T, B, H), jnp.float32),
        in_specs=[_fs((T, B, H)), _fs((T, B, H)), _fs((T, B, H)),
                  _fs((B, C)), _fs((L, C)), _fs((B, L)),
                  _fs((3, H, H)), _fs((3, L, H)), _fs((3, 1, H)), _fs((3, 1, H)),
                  _fs((H, L)), _fs((1, L))],
        out_specs=_fs((T, B, H)),
        scratch_shapes=[pltpu.VMEM((B, H), jnp.float32),
                        pltpu.VMEM((B, L), jnp.float32)],
        compiler_params=pltpu.CompilerParams(vmem_limit_bytes=_VMEM_LIMIT),
    )(gi_r, gi_z, gi_n, prob, uemb, item_h,
      g["whh"], fw, fb, g["bhh"], g["attn_wt"], g["attn_b"])

    out_bt = jnp.transpose(out, (1, 0, 2)).reshape(B * T, H)
    return linear_tiled(out_bt, params["o2v_wt"], cast_bf16=O2V_BF16)


def network_forward(params, reviews, review_lens, user_ids, item_ids,
                    random_flag, forward_flag):
    if forward_flag == "encode":
        return encode(params, reviews, review_lens, user_ids, item_ids)
    elif forward_flag == "decode":
        return decode(params, reviews, user_ids, item_ids, random_flag)
    return None


# =============================================================================
# deterministic parameter init (shapes from _NETWORK.__init__), per-gate layout:
# wih[g] = W_ih[g*H:(g+1)*H].T, gate order (r, z, n) as in PyTorch.
# =============================================================================
def init_params(key, V, E, H, L, C, U, ITEMS):
    def nrm(k, shape, s=0.1):
        return s * jax.random.normal(k, shape, dtype=jnp.float32)

    ks = iter(jax.random.split(key, 64))

    def gru_p(in_size):
        return {"wih": nrm(next(ks), (3, in_size, H)),
                "whh": nrm(next(ks), (3, H, H)),
                "bih": nrm(next(ks), (3, 1, H)),
                "bhh": nrm(next(ks), (3, 1, H))}

    def enc_p():
        return {"f": gru_p(E),
                "b": gru_p(E),
                "h2l_f_wt": nrm(next(ks), (H, L)),   # hidden2latent W.T[:H]
                "h2l_b_wt": nrm(next(ks), (H, L)),   # hidden2latent W.T[H:]
                "h2l_b": nrm(next(ks), (1, L))}

    def dec_p():
        p = {"l2o_wt": nrm(next(ks), (L, E)), "l2o_b": nrm(next(ks), (1, E))}
        p.update(gru_p(E))
        return p

    gen = {"l2o_wt": nrm(next(ks), (L, E)), "l2o_b": nrm(next(ks), (1, E)),
           "attn_wt": nrm(next(ks), (H, L)), "attn_b": nrm(next(ks), (1, L))}
    gen.update(gru_p(E))

    prob = jax.random.uniform(next(ks), (U, C), dtype=jnp.float32) + 0.1
    prob = prob / jnp.sum(prob, axis=1, keepdims=True)

    return {
        "embedding": nrm(next(ks), (V, E)),
        "o2v_wt": nrm(next(ks), (H, V)),           # output2vocab weight.T, no bias
        "user_embedding": nrm(next(ks), (L, C)),   # buffer (random instead of zeros)
        "user_cluster_prob": prob,                 # buffer (random instead of zeros)
        "item_embedding": nrm(next(ks), (ITEMS, L)),
        "user_enc": enc_p(),
        "item_enc": enc_p(),
        "user_dec": dec_p(),
        "item_dec": dec_p(),
        "gen": gen,
        "commitment": 0.25,
    }


# =============================================================================
if __name__ == "__main__":
    # small, self-consistent sizes (embedding_size == hidden_size is required by
    # the reference: GRU input size is hidden_size but receives embeddings).
    # T must be a multiple of 8 (in-kernel (B,T,E)->(B*T,E) reshape tiling).
    V, E, H, L, C = 64, 32, 32, 16, 8
    U, ITEMS = 8, 8
    B, T = 2, 8

    key = jax.random.PRNGKey(0)
    kp, kr, kl, ku, ki = jax.random.split(key, 5)
    params = init_params(kp, V, E, H, L, C, U, ITEMS)

    reviews = jax.random.randint(kr, (B, T), 0, V, dtype=jnp.int32)
    review_lens = jnp.array([T, T - 3], dtype=jnp.int32)
    user_ids = jax.random.randint(ku, (B,), 0, U, dtype=jnp.int32)
    item_ids = jax.random.randint(ki, (B,), 0, ITEMS, dtype=jnp.int32)

    user_logits, item_logits, quant_diff = network_forward(
        params, reviews, review_lens, user_ids, item_ids, 0, "encode")
    gen_logits = network_forward(
        params, reviews, review_lens, user_ids, item_ids, 0, "decode")

    jax.block_until_ready((user_logits, item_logits, quant_diff, gen_logits))
    assert user_logits.shape == (B * T, V)
    assert item_logits.shape == (B * T, V)
    assert gen_logits.shape == (B * T, V)
    print("KERNEL_OK")
</pallas_src>

<mosaic_0001>
module attributes {stable_mosaic.version = 11 : i64} {
  func.func @_bigru_encoder_kernel(%arg0: i32, %arg1: memref<2xi32, #tpu.memory_space<smem>>, %arg2: memref<2x8x32xf32, #tpu.memory_space<vmem>>, %arg3: memref<1x3x32x32xf32, #tpu.memory_space<vmem>>, %arg4: memref<1x3x32x32xf32, #tpu.memory_space<vmem>>, %arg5: memref<1x3x1x32xf32, #tpu.memory_space<vmem>>, %arg6: memref<1x3x1x32xf32, #tpu.memory_space<vmem>>, %arg7: memref<1x3x32x32xf32, #tpu.memory_space<vmem>>, %arg8: memref<1x3x32x32xf32, #tpu.memory_space<vmem>>, %arg9: memref<1x3x1x32xf32, #tpu.memory_space<vmem>>, %arg10: memref<1x3x1x32xf32, #tpu.memory_space<vmem>>, %arg11: memref<1x32x16xf32, #tpu.memory_space<vmem>>, %arg12: memref<1x32x16xf32, #tpu.memory_space<vmem>>, %arg13: memref<1x1x16xf32, #tpu.memory_space<vmem>>, %arg14: memref<1x2x16xf32, #tpu.memory_space<vmem>>, %arg15: memref<2x8x32xf32, #tpu.memory_space<vmem>>, %arg16: memref<2x8x32xf32, #tpu.memory_space<vmem>>, %arg17: memref<2x8x32xf32, #tpu.memory_space<vmem>>, %arg18: memref<8x32xf32, #tpu.memory_space<vmem>>, %arg19: memref<2x32xf32, #tpu.memory_space<vmem>>, %arg20: memref<2x32xf32, #tpu.memory_space<vmem>>) attributes {dimension_semantics = [#tpu.dimension_semantics<parallel>], iteration_bounds = array<i64: 2>, scalar_prefetch = 0 : i64, scratch_operands = 6 : i64, tpu.core_type = #tpu.core_type<tc>, window_params = [{transform_indices = @transform_0, window_bounds = array<i64: 2>}, {pipeline_mode = #tpu.pipeline_mode<synchronous>, transform_indices = @transform_1, window_bounds = array<i64: 2, 8, 32>}, {transform_indices = @transform_2, window_bounds = array<i64: 1, 3, 32, 32>}, {transform_indices = @transform_3, window_bounds = array<i64: 1, 3, 32, 32>}, {transform_indices = @transform_4, window_bounds = array<i64: 1, 3, 1, 32>}, {transform_indices = @transform_5, window_bounds = array<i64: 1, 3, 1, 32>}, {transform_indices = @transform_6, window_bounds = array<i64: 1, 3, 32, 32>}, {transform_indices = @transform_7, window_bounds = array<i64: 1, 3, 32, 32>}, {transform_indices = @transform_8, window_bounds = array<i64: 1, 3, 1, 32>}, {transform_indices = @transform_9, window_bounds = array<i64: 1, 3, 1, 32>}, {transform_indices = @transform_10, window_bounds = array<i64: 1, 32, 16>}, {transform_indices = @transform_11, window_bounds = array<i64: 1, 32, 16>}, {transform_indices = @transform_12, window_bounds = array<i64: 1, 1, 16>}, {transform_indices = @transform_13, window_bounds = array<i64: 1, 2, 16>}]} {
    %c0 = arith.constant 0 : index
    %c0_0 = arith.constant 0 : index
    %c0_1 = arith.constant 0 : index
    %0 = vector.load %arg2[%c0, %c0_0, %c0_1] : memref<2x8x32xf32, #tpu.memory_space<vmem>>, vector<2x8x32xf32>
    %1 = vector.shape_cast %0 : vector<2x8x32xf32> to vector<16x32xf32>
    %2 = tpu.iota {dimensions = array<i32: 0>} : vector<8x1xi32>
    %c0_2 = arith.constant 0 : index
    %c0_3 = arith.constant 0 : index
    %c0_4 = arith.constant 0 : index
    %c0_5 = arith.constant 0 : index
    %3 = vector.load %arg3[%c0_2, %c0_3, %c0_4, %c0_5] : memref<1x3x32x32xf32, #tpu.memory_space<vmem>>, vector<1x1x32x32xf32>
    %4 = vector.shape_cast %3 : vector<1x1x32x32xf32> to vector<32x32xf32>
    %cst = arith.constant dense<0.000000e+00> : vector<16x32xf32>
    %5 = tpu.matmul %1, %4, %cst {dimension_numbers = #tpu.dot_dimension_numbers<[1], [0], [0], [1], [0, 0, 1, 1], [], []>} : vector<16x32xf32>, vector<32x32xf32>, vector<16x32xf32> -> vector<16x32xf32>
    %c0_6 = arith.constant 0 : index
    %c0_7 = arith.constant 0 : index
    %c0_8 = arith.constant 0 : index
    %c0_9 = arith.constant 0 : index
    %6 = vector.load %arg5[%c0_6, %c0_7, %c0_8, %c0_9] : memref<1x3x1x32xf32, #tpu.memory_space<vmem>>, vector<1x1x1x32xf32>
    %7 = vector.shape_cast %6 : vector<1x1x1x32xf32> to vector<1x32xf32>
    %8 = vector.broadcast %7 : vector<1x32xf32> to vector<16x32xf32>
    %9 = arith.addf %5, %8 : vector<16x32xf32>
    %10 = vector.shape_cast %9 : vector<16x32xf32> to vector<2x8x32xf32>
    %c0_10 = arith.constant 0 : index
    %c0_11 = arith.constant 0 : index
    %c0_12 = arith.constant 0 : index
    %11 = vector.load %arg15[%c0_10, %c0_11, %c0_12] : memref<2x8x32xf32, #tpu.memory_space<vmem>>, vector<2x8x32xf32>
    tpu.vector_store %arg15[%c0_10, %c0_11, %c0_12], %10 {strides = array<i32>} : memref<2x8x32xf32, #tpu.memory_space<vmem>>, vector<2x8x32xf32>,
    %c0_13 = arith.constant 0 : index
    %c1 = arith.constant 1 : index
    %c0_14 = arith.constant 0 : index
    %c0_15 = arith.constant 0 : index
    %12 = vector.load %arg3[%c0_13, %c1, %c0_14, %c0_15] : memref<1x3x32x32xf32, #tpu.memory_space<vmem>>, vector<1x1x32x32xf32>
    %13 = vector.shape_cast %12 : vector<1x1x32x32xf32> to vector<32x32xf32>
    %cst_16 = arith.constant dense<0.000000e+00> : vector<16x32xf32>
    %14 = tpu.matmul %1, %13, %cst_16 {dimension_numbers = #tpu.dot_dimension_numbers<[1], [0], [0], [1], [0, 0, 1, 1], [], []>} : vector<16x32xf32>, vector<32x32xf32>, vector<16x32xf32> -> vector<16x32xf32>
    %c0_17 = arith.constant 0 : index
    %c1_18 = arith.constant 1 : index
    %c0_19 = arith.constant 0 : index
    %c0_20 = arith.constant 0 : index
    %15 = vector.load %arg5[%c0_17, %c1_18, %c0_19, %c0_20] : memref<1x3x1x32xf32, #tpu.memory_space<vmem>>, vector<1x1x1x32xf32>
    %16 = vector.shape_cast %15 : vector<1x1x1x32xf32> to vector<1x32xf32>
    %17 = vector.broadcast %16 : vector<1x32xf32> to vector<16x32xf32>
    %18 = arith.addf %14, %17 : vector<16x32xf32>
    %19 = vector.shape_cast %18 : vector<16x32xf32> to vector<2x8x32xf32>
    %c0_21 = arith.constant 0 : index
    %c0_22 = arith.constant 0 : index
    %c0_23 = arith.constant 0 : index
    %20 = vector.load %arg16[%c0_21, %c0_22, %c0_23] : memref<2x8x32xf32, #tpu.memory_space<vmem>>, vector<2x8x32xf32>
    tpu.vector_store %arg16[%c0_21, %c0_22, %c0_23], %19 {strides = array<i32>} : memref<2x8x32xf32, #tpu.memory_space<vmem>>, vector<2x8x32xf32>,
    %c0_24 = arith.constant 0 : index
    %c2 = arith.constant 2 : index
    %c0_25 = arith.constant 0 : index
    %c0_26 = arith.constant 0 : index
    %21 = vector.load %arg3[%c0_24, %c2, %c0_25, %c0_26] : memref<1x3x32x32xf32, #tpu.memory_space<vmem>>, vector<1x1x32x32xf32>
    %22 = vector.shape_cast %21 : vector<1x1x32x32xf32> to vector<32x32xf32>
    %cst_27 = arith.constant dense<0.000000e+00> : vector<16x32xf32>
    %23 = tpu.matmul %1, %22, %cst_27 {dimension_numbers = #tpu.dot_dimension_numbers<[1], [0], [0], [1], [0, 0, 1, 1], [], []>} : vector<16x32xf32>, vector<32x32xf32>, vector<16x32xf32> -> vector<16x32xf32>
    %c0_28 = arith.constant 0 : index
    %c2_29 = arith.constant 2 : index
    %c0_30 = arith.constant 0 : index
    %c0_31 = arith.constant 0 : index
    %24 = vector.load %arg5[%c0_28, %c2_29, %c0_30, %c0_31] : memref<1x3x1x32xf32, #tpu.memory_space<vmem>>, vector<1x1x1x32xf32>
    %25 = vector.shape_cast %24 : vector<1x1x1x32xf32> to vector<1x32xf32>
    %26 = vector.broadcast %25 : vector<1x32xf32> to vector<16x32xf32>
    %27 = arith.addf %23, %26 : vector<16x32xf32>
    %28 = vector.shape_cast %27 : vector<16x32xf32> to vector<2x8x32xf32>
    %c0_32 = arith.constant 0 : index
    %c0_33 = arith.constant 0 : index
    %c0_34 = arith.constant 0 : index
    %29 = vector.load %arg17[%c0_32, %c0_33, %c0_34] : memref<2x8x32xf32, #tpu.memory_space<vmem>>, vector<2x8x32xf32>
    tpu.vector_store %arg17[%c0_32, %c0_33, %c0_34], %28 {strides = array<i32>} : memref<2x8x32xf32, #tpu.memory_space<vmem>>, vector<2x8x32xf32>,
    %c0_35 = arith.constant 0 : index
    %c0_36 = arith.constant 0 : index
    %c0_37 = arith.constant 0 : index
    %c0_38 = arith.constant 0 : index
    %30 = vector.load %arg4[%c0_35, %c0_36, %c0_37, %c0_38] : memref<1x3x32x32xf32, #tpu.memory_space<vmem>>, vector<1x1x32x32xf32>
    %31 = vector.shape_cast %30 : vector<1x1x32x32xf32> to vector<32x32xf32>
    %c0_39 = arith.constant 0 : index
    %c1_40 = arith.constant 1 : index
    %c0_41 = arith.constant 0 : index
    %c0_42 = arith.constant 0 : index
    %32 = vector.load %arg4[%c0_39, %c1_40, %c0_41, %c0_42] : memref<1x3x32x32xf32, #tpu.memory_space<vmem>>, vector<1x1x32x32xf32>
    %33 = vector.shape_cast %32 : vector<1x1x32x32xf32> to vector<32x32xf32>
    %c0_43 = arith.constant 0 : index
    %c2_44 = arith.constant 2 : index
    %c0_45 = arith.constant 0 : index
    %c0_46 = arith.constant 0 : index
    %34 = vector.load %arg4[%c0_43, %c2_44, %c0_45, %c0_46] : memref<1x3x32x32xf32, #tpu.memory_space<vmem>>, vector<1x1x32x32xf32>
    %35 = vector.shape_cast %34 : vector<1x1x32x32xf32> to vector<32x32xf32>
    %c0_47 = arith.constant 0 : index
    %c0_48 = arith.constant 0 : index
    %c0_49 = arith.constant 0 : index
    %c0_50 = arith.constant 0 : index
    %36 = vector.load %arg6[%c0_47, %c0_48, %c0_49, %c0_50] : memref<1x3x1x32xf32, #tpu.memory_space<vmem>>, vector<1x1x1x32xf32>
    %37 = vector.shape_cast %36 : vector<1x1x1x32xf32> to vector<1x32xf32>
    %c0_51 = arith.constant 0 : index
    %c1_52 = arith.constant 1 : index
    %c0_53 = arith.constant 0 : index
    %c0_54 = arith.constant 0 : index
    %38 = vector.load %arg6[%c0_51, %c1_52, %c0_53, %c0_54] : memref<1x3x1x32xf32, #tpu.memory_space<vmem>>, vector<1x1x1x32xf32>
    %39 = vector.shape_cast %38 : vector<1x1x1x32xf32> to vector<1x32xf32>
    %c0_55 = arith.constant 0 : index
    %c2_56 = arith.constant 2 : index
    %c0_57 = arith.constant 0 : index
    %c0_58 = arith.constant 0 : index
    %40 = vector.load %arg6[%c0_55, %c2_56, %c0_57, %c0_58] : memref<1x3x1x32xf32, #tpu.memory_space<vmem>>, vector<1x1x1x32xf32>
    %41 = vector.shape_cast %40 : vector<1x1x1x32xf32> to vector<1x32xf32>
    %cst_59 = arith.constant 0.000000e+00 : f32
    %42 = vector.broadcast %cst_59 : f32 to vector<8x32xf32>
    %c0_60 = arith.constant 0 : index
    %c0_61 = arith.constant 0 : index
    %43 = vector.load %arg18[%c0_60, %c0_61] : memref<8x32xf32, #tpu.memory_space<vmem>>, vector<8x32xf32>
    tpu.vector_store %arg18[%c0_60, %c0_61], %42 {strides = array<i32>} : memref<8x32xf32, #tpu.memory_space<vmem>>, vector<8x32xf32>,
    %c0_i32 = arith.constant 0 : i32
    %c0_62 = arith.constant 0 : index
    %c0_63 = arith.constant 0 : index
    %44 = vector.load %arg18[%c0_62, %c0_63] : memref<8x32xf32, #tpu.memory_space<vmem>>, vector<8x32xf32>
    %cst_64 = arith.constant dense<0.000000e+00> : vector<8x32xf32>
    %45 = tpu.matmul %44, %31, %cst_64 {dimension_numbers = #tpu.dot_dimension_numbers<[1], [0], [0], [1], [0, 0, 1, 1], [], []>} : vector<8x32xf32>, vector<32x32xf32>, vector<8x32xf32> -> vector<8x32xf32>
    %46 = vector.broadcast %37 : vector<1x32xf32> to vector<8x32xf32>
    %47 = arith.addf %45, %46 : vector<8x32xf32>
    %cst_65 = arith.constant dense<0.000000e+00> : vector<8x32xf32>
    %48 = tpu.matmul %44, %33, %cst_65 {dimension_numbers = #tpu.dot_dimension_numbers<[1], [0], [0], [1], [0, 0, 1, 1], [], []>} : vector<8x32xf32>, vector<32x32xf32>, vector<8x32xf32> -> vector<8x32xf32>
    %49 = vector.broadcast %39 : vector<1x32xf32> to vector<8x32xf32>
    %50 = arith.addf %48, %49 : vector<8x32xf32>
    %cst_66 = arith.constant dense<0.000000e+00> : vector<8x32xf32>
    %51 = tpu.matmul %44, %35, %cst_66 {dimension_numbers = #tpu.dot_dimension_numbers<[1], [0], [0], [1], [0, 0, 1, 1], [], []>} : vector<8x32xf32>, vector<32x32xf32>, vector<8x32xf32> -> vector<8x32xf32>
    %52 = vector.broadcast %41 : vector<1x32xf32> to vector<8x32xf32>
    %53 = arith.addf %51, %52 : vector<8x32xf32>
    %54 = arith.index_cast %c0_i32 : i32 to index
    %c0_67 = arith.constant 0 : index
    %c0_68 = arith.constant 0 : index
    %55 = vector.load %arg15[%54, %c0_67, %c0_68] : memref<2x8x32xf32, #tpu.memory_space<vmem>>, vector<1x8x32xf32>
    %56 = vector.shape_cast %55 : vector<1x8x32xf32> to vector<8x32xf32>
    %57 = arith.addf %56, %47 : vector<8x32xf32>
    %58 = arith.negf %57 : vector<8x32xf32>
    %59 = math.exp %58 : vector<8x32xf32>
    %cst_69 = arith.constant 1.000000e+00 : f32
    %60 = vector.broadcast %cst_69 : f32 to vector<8x32xf32>
    %61 = arith.addf %60, %59 : vector<8x32xf32>
    %62 = arith.divf %60, %61 : vector<8x32xf32>
    %63 = arith.index_cast %c0_i32 : i32 to index
    %c0_70 = arith.constant 0 : index
    %c0_71 = arith.constant 0 : index
    %64 = vector.load %arg16[%63, %c0_70, %c0_71] : memref<2x8x32xf32, #tpu.memory_space<vmem>>, vector<1x8x32xf32>
    %65 = vector.shape_cast %64 : vector<1x8x32xf32> to vector<8x32xf32>
    %66 = arith.addf %65, %50 : vector<8x32xf32>
    %67 = arith.negf %66 : vector<8x32xf32>
    %68 = math.exp %67 : vector<8x32xf32>
    %cst_72 = arith.constant 1.000000e+00 : f32
    %69 = vector.broadcast %cst_72 : f32 to vector<8x32xf32>
    %70 = arith.addf %69, %68 : vector<8x32xf32>
    %71 = arith.divf %69, %70 : vector<8x32xf32>
    %72 = arith.index_cast %c0_i32 : i32 to index
    %c0_73 = arith.constant 0 : index
    %c0_74 = arith.constant 0 : index
    %73 = vector.load %arg17[%72, %c0_73, %c0_74] : memref<2x8x32xf32, #tpu.memory_space<vmem>>, vector<1x8x32xf32>
    %74 = vector.shape_cast %73 : vector<1x8x32xf32> to vector<8x32xf32>
    %75 = arith.mulf %62, %53 : vector<8x32xf32>
    %76 = arith.addf %74, %75 : vector<8x32xf32>
    %77 = math.tanh %76 : vector<8x32xf32>
    %cst_75 = arith.constant 1.000000e+00 : f32
    %78 = vector.broadcast %cst_75 : f32 to vector<8x32xf32>
    %79 = arith.subf %78, %71 : vector<8x32xf32>
    %80 = arith.mulf %79, %77 : vector<8x32xf32>
    %81 = arith.mulf %71, %44 : vector<8x32xf32>
    %82 = arith.addf %80, %81 : vector<8x32xf32>
    %c0_76 = arith.constant 0 : index
    %c0_77 = arith.constant 0 : index
    %83 = vector.load %arg18[%c0_76, %c0_77] : memref<8x32xf32, #tpu.memory_space<vmem>>, vector<8x32xf32>
    tpu.vector_store %arg18[%c0_76, %c0_77], %82 {strides = array<i32>} : memref<8x32xf32, #tpu.memory_space<vmem>>, vector<8x32xf32>,
    %84 = arith.index_cast %c0_i32 : i32 to index
    %85 = memref.load %arg1[%84] : memref<2xi32, #tpu.memory_space<smem>>
    %c1_i32 = arith.constant 1 : i32
    %86 = arith.subi %85, %c1_i32 : i32
    %87 = vector.broadcast %86 : i32 to vector<8x1xi32>
    %88 = arith.cmpi eq, %2, %87 : vector<8x1xi32>
    %cst_78 = arith.constant 0.000000e+00 : f32
    %89 = vector.shape_cast %88 : vector<8x1xi1> to vector<8x1xi1>
    %90 = vector.broadcast %89 : vector<8x1xi1> to vector<8x32xi1>
    %91 = vector.broadcast %cst_78 : f32 to vector<8x32xf32>
    %92 = arith.select %90, %82, %91 : vector<8x32xi1>, vector<8x32xf32>
    %cst_79 = arith.constant dense<0.000000e+00> : vector<32xf32>
    %93 = vector.multi_reduction <add>, %92, %cst_79 [0] : vector<8x32xf32> to vector<32xf32>
    %94 = vector.shape_cast %93 : vector<32xf32> to vector<1x32xf32>
    %95 = arith.index_cast %c0_i32 : i32 to index
    %c0_80 = arith.constant 0 : index
    %96 = vector.load %arg19[%95, %c0_80] : memref<2x32xf32, #tpu.memory_space<vmem>>, vector<1x32xf32>
    tpu.vector_store %arg19[%95, %c0_80], %94 {strides = array<i32>} : memref<2x32xf32, #tpu.memory_space<vmem>>, vector<1x32xf32>,
    %c1_i32_81 = arith.constant 1 : i32
    %c0_82 = arith.constant 0 : index
    %c0_83 = arith.constant 0 : index
    %97 = vector.load %arg18[%c0_82, %c0_83] : memref<8x32xf32, #tpu.memory_space<vmem>>, vector<8x32xf32>
    %cst_84 = arith.constant dense<0.000000e+00> : vector<8x32xf32>
    %98 = tpu.matmul %97, %31, %cst_84 {dimension_numbers = #tpu.dot_dimension_numbers<[1], [0], [0], [1], [0, 0, 1, 1], [], []>} : vector<8x32xf32>, vector<32x32xf32>, vector<8x32xf32> -> vector<8x32xf32>
    %99 = vector.broadcast %37 : vector<1x32xf32> to vector<8x32xf32>
    %100 = arith.addf %98, %99 : vector<8x32xf32>
    %cst_85 = arith.constant dense<0.000000e+00> : vector<8x32xf32>
    %101 = tpu.matmul %97, %33, %cst_85 {dimension_numbers = #tpu.dot_dimension_numbers<[1], [0], [0], [1], [0, 0, 1, 1], [], []>} : vector<8x32xf32>, vector<32x32xf32>, vector<8x32xf32> -> vector<8x32xf32>
    %102 = vector.broadcast %39 : vector<1x32xf32> to vector<8x32xf32>
    %103 = arith.addf %101, %102 : vector<8x32xf32>
    %cst_86 = arith.constant dense<0.000000e+00> : vector<8x32xf32>
    %104 = tpu.matmul %97, %35, %cst_86 {dimension_numbers = #tpu.dot_dimension_numbers<[1], [0], [0], [1], [0, 0, 1, 1], [], []>} : vector<8x32xf32>, vector<32x32xf32>, vector<8x32xf32> -> vector<8x32xf32>
    %105 = vector.broadcast %41 : vector<1x32xf32> to vector<8x32xf32>
    %106 = arith.addf %104, %105 : vector<8x32xf32>
    %107 = arith.index_cast %c1_i32_81 : i32 to index
    %c0_87 = arith.constant 0 : index
    %c0_88 = arith.constant 0 : index
    %108 = vector.load %arg15[%107, %c0_87, %c0_88] : memref<2x8x32xf32, #tpu.memory_space<vmem>>, vector<1x8x32xf32>
    %109 = vector.shape_cast %108 : vector<1x8x32xf32> to vector<8x32xf32>
    %110 = arith.addf %109, %100 : vector<8x32xf32>
    %111 = arith.negf %110 : vector<8x32xf32>
    %112 = math.exp %111 : vector<8x32xf32>
    %cst_89 = arith.constant 1.000000e+00 : f32
    %113 = vector.broadcast %cst_89 : f32 to vector<8x32xf32>
    %114 = arith.addf %113, %112 : vector<8x32xf32>
    %115 = arith.divf %113, %114 : vector<8x32xf32>
    %116 = arith.index_cast %c1_i32_81 : i32 to index
    %c0_90 = arith.constant 0 : index
    %c0_91 = arith.constant 0 : index
    %117 = vector.load %arg16[%116, %c0_90, %c0_91] : memref<2x8x32xf32, #tpu.memory_space<vmem>>, vector<1x8x32xf32>
    %118 = vector.shape_cast %117 : vector<1x8x32xf32> to vector<8x32xf32>
    %119 = arith.addf %118, %103 : vector<8x32xf32>
    %120 = arith.negf %119 : vector<8x32xf32>
    %121 = math.exp %120 : vector<8x32xf32>
    %cst_92 = arith.constant 1.000000e+00 : f32
    %122 = vector.broadcast %cst_92 : f32 to vector<8x32xf32>
    %123 = arith.addf %122, %121 : vector<8x32xf32>
    %124 = arith.divf %122, %123 : vector<8x32xf32>
    %125 = arith.index_cast %c1_i32_81 : i32 to index
    %c0_93 = arith.constant 0 : index
    %c0_94 = arith.constant 0 : index
    %126 = vector.load %arg17[%125, %c0_93, %c0_94] : memref<2x8x32xf32, #tpu.memory_space<vmem>>, vector<1x8x32xf32>
    %127 = vector.shape_cast %126 : vector<1x8x32xf32> to vector<8x32xf32>
    %128 = arith.mulf %115, %106 : vector<8x32xf32>
    %129 = arith.addf %127, %128 : vector<8x32xf32>
    %130 = math.tanh %129 : vector<8x32xf32>
    %cst_95 = arith.constant 1.000000e+00 : f32
    %131 = vector.broadcast %cst_95 : f32 to vector<8x32xf32>
    %132 = arith.subf %131, %124 : vector<8x32xf32>
    %133 = arith.mulf %132, %130 : vector<8x32xf32>
    %134 = arith.mulf %124, %97 : vector<8x32xf32>
    %135 = arith.addf %133, %134 : vector<8x32xf32>
    %c0_96 = arith.constant 0 : index
    %c0_97 = arith.constant 0 : index
    %136 = vector.load %arg18[%c0_96, %c0_97] : memref<8x32xf32, #tpu.memory_space<vmem>>, vector<8x32xf32>
    tpu.vector_store %arg18[%c0_96, %c0_97], %135 {strides = array<i32>} : memref<8x32xf32, #tpu.memory_space<vmem>>, vector<8x32xf32>,
    %137 = arith.index_cast %c1_i32_81 : i32 to index
    %138 = memref.load %arg1[%137] : memref<2xi32, #tpu.memory_space<smem>>
    %c1_i32_98 = arith.constant 1 : i32
    %139 = arith.subi %138, %c1_i32_98 : i32
    %140 = vector.broadcast %139 : i32 to vector<8x1xi32>
    %141 = arith.cmpi eq, %2, %140 : vector<8x1xi32>
    %cst_99 = arith.constant 0.000000e+00 : f32
    %142 = vector.shape_cast %141 : vector<8x1xi1> to vector<8x1xi1>
    %143 = vector.broadcast %142 : vector<8x1xi1> to vector<8x32xi1>
    %144 = vector.broadcast %cst_99 : f32 to vector<8x32xf32>
    %145 = arith.select %143, %135, %144 : vector<8x32xi1>, vector<8x32xf32>
    %cst_100 = arith.constant dense<0.000000e+00> : vector<32xf32>
    %146 = vector.multi_reduction <add>, %145, %cst_100 [0] : vector<8x32xf32> to vector<32xf32>
    %147 = vector.shape_cast %146 : vector<32xf32> to vector<1x32xf32>
    %148 = arith.index_cast %c1_i32_81 : i32 to index
    %c0_101 = arith.constant 0 : index
    %149 = vector.load %arg19[%148, %c0_101] : memref<2x32xf32, #tpu.memory_space<vmem>>, vector<1x32xf32>
    tpu.vector_store %arg19[%148, %c0_101], %147 {strides = array<i32>} : memref<2x32xf32, #tpu.memory_space<vmem>>, vector<1x32xf32>,
    %c2_i32 = arith.constant 2 : i32
    %c0_102 = arith.constant 0 : index
    %c0_103 = arith.constant 0 : index
    %c0_104 = arith.constant 0 : index
    %c0_105 = arith.constant 0 : index
    %150 = vector.load %arg7[%c0_102, %c0_103, %c0_104, %c0_105] : memref<1x3x32x32xf32, #tpu.memory_space<vmem>>, vector<1x1x32x32xf32>
    %151 = vector.shape_cast %150 : vector<1x1x32x32xf32> to vector<32x32xf32>
    %cst_106 = arith.constant dense<0.000000e+00> : vector<16x32xf32>
    %152 = tpu.matmul %1, %151, %cst_106 {dimension_numbers = #tpu.dot_dimension_numbers<[1], [0], [0], [1], [0, 0, 1, 1], [], []>} : vector<16x32xf32>, vector<32x32xf32>, vector<16x32xf32> -> vector<16x32xf32>
    %c0_107 = arith.constant 0 : index
    %c0_108 = arith.constant 0 : index
    %c0_109 = arith.constant 0 : index
    %c0_110 = arith.constant 0 : index
    %153 = vector.load %arg9[%c0_107, %c0_108, %c0_109, %c0_110] : memref<1x3x1x32xf32, #tpu.memory_space<vmem>>, vector<1x1x1x32xf32>
    %154 = vector.shape_cast %153 : vector<1x1x1x32xf32> to vector<1x32xf32>
    %155 = vector.broadcast %154 : vector<1x32xf32> to vector<16x32xf32>
    %156 = arith.addf %152, %155 : vector<16x32xf32>
    %157 = vector.shape_cast %156 : vector<16x32xf32> to vector<2x8x32xf32>
    %c0_111 = arith.constant 0 : index
    %c0_112 = arith.constant 0 : index
    %c0_113 = arith.constant 0 : index
    %158 = vector.load %arg15[%c0_111, %c0_112, %c0_113] : memref<2x8x32xf32, #tpu.memory_space<vmem>>, vector<2x8x32xf32>
    tpu.vector_store %arg15[%c0_111, %c0_112, %c0_113], %157 {strides = array<i32>} : memref<2x8x32xf32, #tpu.memory_space<vmem>>, vector<2x8x32xf32>,
    %c0_114 = arith.constant 0 : index
    %c1_115 = arith.constant 1 : index
    %c0_116 = arith.constant 0 : index
    %c0_117 = arith.constant 0 : index
    %159 = vector.load %arg7[%c0_114, %c1_115, %c0_116, %c0_117] : memref<1x3x32x32xf32, #tpu.memory_space<vmem>>, vector<1x1x32x32xf32>
    %160 = vector.shape_cast %159 : vector<1x1x32x32xf32> to vector<32x32xf32>
    %cst_118 = arith.constant dense<0.000000e+00> : vector<16x32xf32>
    %161 = tpu.matmul %1, %160, %cst_118 {dimension_numbers = #tpu.dot_dimension_numbers<[1], [0], [0], [1], [0, 0, 1, 1], [], []>} : vector<16x32xf32>, vector<32x32xf32>, vector<16x32xf32> -> vector<16x32xf32>
    %c0_119 = arith.constant 0 : index
    %c1_120 = arith.constant 1 : index
    %c0_121 = arith.constant 0 : index
    %c0_122 = arith.constant 0 : index
    %162 = vector.load %arg9[%c0_119, %c1_120, %c0_121, %c0_122] : memref<1x3x1x32xf32, #tpu.memory_space<vmem>>, vector<1x1x1x32xf32>
    %163 = vector.shape_cast %162 : vector<1x1x1x32xf32> to vector<1x32xf32>
    %164 = vector.broadcast %163 : vector<1x32xf32> to vector<16x32xf32>
    %165 = arith.addf %161, %164 : vector<16x32xf32>
    %166 = vector.shape_cast %165 : vector<16x32xf32> to vector<2x8x32xf32>
    %c0_123 = arith.constant 0 : index
    %c0_124 = arith.constant 0 : index
    %c0_125 = arith.constant 0 : index
    %167 = vector.load %arg16[%c0_123, %c0_124, %c0_125] : memref<2x8x32xf32, #tpu.memory_space<vmem>>, vector<2x8x32xf32>
    tpu.vector_store %arg16[%c0_123, %c0_124, %c0_125], %166 {strides = array<i32>} : memref<2x8x32xf32, #tpu.memory_space<vmem>>, vector<2x8x32xf32>,
    %c0_126 = arith.constant 0 : index
    %c2_127 = arith.constant 2 : index
    %c0_128 = arith.constant 0 : index
    %c0_129 = arith.constant 0 : index
    %168 = vector.load %arg7[%c0_126, %c2_127, %c0_128, %c0_129] : memref<1x3x32x32xf32, #tpu.memory_space<vmem>>, vector<1x1x32x32xf32>
    %169 = vector.shape_cast %168 : vector<1x1x32x32xf32> to vector<32x32xf32>
    %cst_130 = arith.constant dense<0.000000e+00> : vector<16x32xf32>
    %170 = tpu.matmul %1, %169, %cst_130 {dimension_numbers = #tpu.dot_dimension_numbers<[1], [0], [0], [1], [0, 0, 1, 1], [], []>} : vector<16x32xf32>, vector<32x32xf32>, vector<16x32xf32> -> vector<16x32xf32>
    %c0_131 = arith.constant 0 : index
    %c2_132 = arith.constant 2 : index
    %c0_133 = arith.constant 0 : index
    %c0_134 = arith.constant 0 : index
    %171 = vector.load %arg9[%c0_131, %c2_132, %c0_133, %c0_134] : memref<1x3x1x32xf32, #tpu.memory_space<vmem>>, vector<1x1x1x32xf32>
    %172 = vector.shape_cast %171 : vector<1x1x1x32xf32> to vector<1x32xf32>
    %173 = vector.broadcast %172 : vector<1x32xf32> to vector<16x32xf32>
    %174 = arith.addf %170, %173 : vector<16x32xf32>
    %175 = vector.shape_cast %174 : vector<16x32xf32> to vector<2x8x32xf32>
    %c0_135 = arith.constant 0 : index
    %c0_136 = arith.constant 0 : index
    %c0_137 = arith.constant 0 : index
    %176 = vector.load %arg17[%c0_135, %c0_136, %c0_137] : memref<2x8x32xf32, #tpu.memory_space<vmem>>, vector<2x8x32xf32>
    tpu.vector_store %arg17[%c0_135, %c0_136, %c0_137], %175 {strides = array<i32>} : memref<2x8x32xf32, #tpu.memory_space<vmem>>, vector<2x8x32xf32>,
    %c0_138 = arith.constant 0 : index
    %c0_139 = arith.constant 0 : index
    %c0_140 = arith.constant 0 : index
    %c0_141 = arith.constant 0 : index
    %177 = vector.load %arg8[%c0_138, %c0_139, %c0_140, %c0_141] : memref<1x3x32x32xf32, #tpu.memory_space<vmem>>, vector<1x1x32x32xf32>
    %178 = vector.shape_cast %177 : vector<1x1x32x32xf32> to vector<32x32xf32>
    %c0_142 = arith.constant 0 : index
    %c1_143 = arith.constant 1 : index
    %c0_144 = arith.constant 0 : index
    %c0_145 = arith.constant 0 : index
    %179 = vector.load %arg8[%c0_142, %c1_143, %c0_144, %c0_145] : memref<1x3x32x32xf32, #tpu.memory_space<vmem>>, vector<1x1x32x32xf32>
    %180 = vector.shape_cast %179 : vector<1x1x32x32xf32> to vector<32x32xf32>
    %c0_146 = arith.constant 0 : index
    %c2_147 = arith.constant 2 : index
    %c0_148 = arith.constant 0 : index
    %c0_149 = arith.constant 0 : index
    %181 = vector.load %arg8[%c0_146, %c2_147, %c0_148, %c0_149] : memref<1x3x32x32xf32, #tpu.memory_space<vmem>>, vector<1x1x32x32xf32>
    %182 = vector.shape_cast %181 : vector<1x1x32x32xf32> to vector<32x32xf32>
    %c0_150 = arith.constant 0 : index
    %c0_151 = arith.constant 0 : index
    %c0_152 = arith.constant 0 : index
    %c0_153 = arith.constant 0 : index
    %183 = vector.load %arg10[%c0_150, %c0_151, %c0_152, %c0_153] : memref<1x3x1x32xf32, #tpu.memory_space<vmem>>, vector<1x1x1x32xf32>
    %184 = vector.shape_cast %183 : vector<1x1x1x32xf32> to vector<1x32xf32>
    %c0_154 = arith.constant 0 : index
    %c1_155 = arith.constant 1 : index
    %c0_156 = arith.constant 0 : index
    %c0_157 = arith.constant 0 : index
    %185 = vector.load %arg10[%c0_154, %c1_155, %c0_156, %c0_157] : memref<1x3x1x32xf32, #tpu.memory_space<vmem>>, vector<1x1x1x32xf32>
    %186 = vector.shape_cast %185 : vector<1x1x1x32xf32> to vector<1x32xf32>
    %c0_158 = arith.constant 0 : index
    %c2_159 = arith.constant 2 : index
    %c0_160 = arith.constant 0 : index
    %c0_161 = arith.constant 0 : index
    %187 = vector.load %arg10[%c0_158, %c2_159, %c0_160, %c0_161] : memref<1x3x1x32xf32, #tpu.memory_space<vmem>>, vector<1x1x1x32xf32>
    %188 = vector.shape_cast %187 : vector<1x1x1x32xf32> to vector<1x32xf32>
    %cst_162 = arith.constant 0.000000e+00 : f32
    %189 = vector.broadcast %cst_162 : f32 to vector<8x32xf32>
    %c0_163 = arith.constant 0 : index
    %c0_164 = arith.constant 0 : index
    %190 = vector.load %arg18[%c0_163, %c0_164] : memref<8x32xf32, #tpu.memory_space<vmem>>, vector<8x32xf32>
    tpu.vector_store %arg18[%c0_163, %c0_164], %189 {strides = array<i32>} : memref<8x32xf32, #tpu.memory_space<vmem>>, vector<8x32xf32>,
    %c0_i32_165 = arith.constant 0 : i32
    %c1_i32_166 = arith.constant 1 : i32
    %191 = arith.subi %c1_i32_166, %c0_i32_165 : i32
    %c0_167 = arith.constant 0 : index
    %c0_168 = arith.constant 0 : index
    %192 = vector.load %arg18[%c0_167, %c0_168] : memref<8x32xf32, #tpu.memory_space<vmem>>, vector<8x32xf32>
    %cst_169 = arith.constant dense<0.000000e+00> : vector<8x32xf32>
    %193 = tpu.matmul %192, %178, %cst_169 {dimension_numbers = #tpu.dot_dimension_numbers<[1], [0], [0], [1], [0, 0, 1, 1], [], []>} : vector<8x32xf32>, vector<32x32xf32>, vector<8x32xf32> -> vector<8x32xf32>
    %194 = vector.broadcast %184 : vector<1x32xf32> to vector<8x32xf32>
    %195 = arith.addf %193, %194 : vector<8x32xf32>
    %cst_170 = arith.constant dense<0.000000e+00> : vector<8x32xf32>
    %196 = tpu.matmul %192, %180, %cst_170 {dimension_numbers = #tpu.dot_dimension_numbers<[1], [0], [0], [1], [0, 0, 1, 1], [], []>} : vector<8x32xf32>, vector<32x32xf32>, vector<8x32xf32> -> vector<8x32xf32>
    %197 = vector.broadcast %186 : vector<1x32xf32> to vector<8x32xf32>
    %198 = arith.addf %196, %197 : vector<8x32xf32>
    %cst_171 = arith.constant dense<0.000000e+00> : vector<8x32xf32>
    %199 = tpu.matmul %192, %182, %cst_171 {dimension_numbers = #tpu.dot_dimension_numbers<[1], [0], [0], [1], [0, 0, 1, 1], [], []>} : vector<8x32xf32>, vector<32x32xf32>, vector<8x32xf32> -> vector<8x32xf32>
    %200 = vector.broadcast %188 : vector<1x32xf32> to vector<8x32xf32>
    %201 = arith.addf %199, %200 : vector<8x32xf32>
    %202 = arith.index_cast %191 : i32 to index
    %c0_172 = arith.constant 0 : index
    %c0_173 = arith.constant 0 : index
    %203 = vector.load %arg15[%202, %c0_172, %c0_173] : memref<2x8x32xf32, #tpu.memory_space<vmem>>, vector<1x8x32xf32>
    %204 = vector.shape_cast %203 : vector<1x8x32xf32> to vector<8x32xf32>
    %205 = arith.addf %204, %195 : vector<8x32xf32>
    %206 = arith.negf %205 : vector<8x32xf32>
    %207 = math.exp %206 : vector<8x32xf32>
    %cst_174 = arith.constant 1.000000e+00 : f32
    %208 = vector.broadcast %cst_174 : f32 to vector<8x32xf32>
    %209 = arith.addf %208, %207 : vector<8x32xf32>
    %210 = arith.divf %208, %209 : vector<8x32xf32>
    %211 = arith.index_cast %191 : i32 to index
    %c0_175 = arith.constant 0 : index
    %c0_176 = arith.constant 0 : index
    %212 = vector.load %arg16[%211, %c0_175, %c0_176] : memref<2x8x32xf32, #tpu.memory_space<vmem>>, vector<1x8x32xf32>
    %213 = vector.shape_cast %212 : vector<1x8x32xf32> to vector<8x32xf32>
    %214 = arith.addf %213, %198 : vector<8x32xf32>
    %215 = arith.negf %214 : vector<8x32xf32>
    %216 = math.exp %215 : vector<8x32xf32>
    %cst_177 = arith.constant 1.000000e+00 : f32
    %217 = vector.broadcast %cst_177 : f32 to vector<8x32xf32>
    %218 = arith.addf %217, %216 : vector<8x32xf32>
    %219 = arith.divf %217, %218 : vector<8x32xf32>
    %220 = arith.index_cast %191 : i32 to index
    %c0_178 = arith.constant 0 : index
    %c0_179 = arith.constant 0 : index
    %221 = vector.load %arg17[%220, %c0_178, %c0_179] : memref<2x8x32xf32, #tpu.memory_space<vmem>>, vector<1x8x32xf32>
    %222 = vector.shape_cast %221 : vector<1x8x32xf32> to vector<8x32xf32>
    %223 = arith.mulf %210, %201 : vector<8x32xf32>
    %224 = arith.addf %222, %223 : vector<8x32xf32>
    %225 = math.tanh %224 : vector<8x32xf32>
    %cst_180 = arith.constant 1.000000e+00 : f32
    %226 = vector.broadcast %cst_180 : f32 to vector<8x32xf32>
    %227 = arith.subf %226, %219 : vector<8x32xf32>
    %228 = arith.mulf %227, %225 : vector<8x32xf32>
    %229 = arith.mulf %219, %192 : vector<8x32xf32>
    %230 = arith.addf %228, %229 : vector<8x32xf32>
    %c0_181 = arith.constant 0 : index
    %c0_182 = arith.constant 0 : index
    %231 = vector.load %arg18[%c0_181, %c0_182] : memref<8x32xf32, #tpu.memory_space<vmem>>, vector<8x32xf32>
    tpu.vector_store %arg18[%c0_181, %c0_182], %230 {strides = array<i32>} : memref<8x32xf32, #tpu.memory_space<vmem>>, vector<8x32xf32>,
    %232 = arith.index_cast %191 : i32 to index
    %233 = memref.load %arg1[%232] : memref<2xi32, #tpu.memory_space<smem>>
    %c1_i32_183 = arith.constant 1 : i32
    %234 = arith.subi %233, %c1_i32_183 : i32
    %235 = vector.broadcast %234 : i32 to vector<8x1xi32>
    %236 = arith.cmpi eq, %2, %235 : vector<8x1xi32>
    %cst_184 = arith.constant 0.000000e+00 : f32
    %237 = vector.shape_cast %236 : vector<8x1xi1> to vector<8x1xi1>
    %238 = vector.broadcast %237 : vector<8x1xi1> to vector<8x32xi1>
    %239 = vector.broadcast %cst_184 : f32 to vector<8x32xf32>
    %240 = arith.select %238, %230, %239 : vector<8x32xi1>, vector<8x32xf32>
    %cst_185 = arith.constant dense<0.000000e+00> : vector<32xf32>
    %241 = vector.multi_reduction <add>, %240, %cst_185 [0] : vector<8x32xf32> to vector<32xf32>
    %242 = vector.shape_cast %241 : vector<32xf32> to vector<1x32xf32>
    %243 = arith.index_cast %191 : i32 to index
    %c0_186 = arith.constant 0 : index
    %244 = vector.load %arg20[%243, %c0_186] : memref<2x32xf32, #tpu.memory_space<vmem>>, vector<1x32xf32>
    tpu.vector_store %arg20[%243, %c0_186], %242 {strides = array<i32>} : memref<2x32xf32, #tpu.memory_space<vmem>>, vector<1x32xf32>,
    %c1_i32_187 = arith.constant 1 : i32
    %c1_i32_188 = arith.constant 1 : i32
    %245 = arith.subi %c1_i32_188, %c1_i32_187 : i32
    %c0_189 = arith.constant 0 : index
    %c0_190 = arith.constant 0 : index
    %246 = vector.load %arg18[%c0_189, %c0_190] : memref<8x32xf32, #tpu.memory_space<vmem>>, vector<8x32xf32>
    %cst_191 = arith.constant dense<0.000000e+00> : vector<8x32xf32>
    %247 = tpu.matmul %246, %178, %cst_191 {dimension_numbers = #tpu.dot_dimension_numbers<[1], [0], [0], [1], [0, 0, 1, 1], [], []>} : vector<8x32xf32>, vector<32x32xf32>, vector<8x32xf32> -> vector<8x32xf32>
    %248 = vector.broadcast %184 : vector<1x32xf32> to vector<8x32xf32>
    %249 = arith.addf %247, %248 : vector<8x32xf32>
    %cst_192 = arith.constant dense<0.000000e+00> : vector<8x32xf32>
    %250 = tpu.matmul %246, %180, %cst_192 {dimension_numbers = #tpu.dot_dimension_numbers<[1], [0], [0], [1], [0, 0, 1, 1], [], []>} : vector<8x32xf32>, vector<32x32xf32>, vector<8x32xf32> -> vector<8x32xf32>
    %251 = vector.broadcast %186 : vector<1x32xf32> to vector<8x32xf32>
    %252 = arith.addf %250, %251 : vector<8x32xf32>
    %cst_193 = arith.constant dense<0.000000e+00> : vector<8x32xf32>
    %253 = tpu.matmul %246, %182, %cst_193 {dimension_numbers = #tpu.dot_dimension_numbers<[1], [0], [0], [1], [0, 0, 1, 1], [], []>} : vector<8x32xf32>, vector<32x32xf32>, vector<8x32xf32> -> vector<8x32xf32>
    %254 = vector.broadcast %188 : vector<1x32xf32> to vector<8x32xf32>
    %255 = arith.addf %253, %254 : vector<8x32xf32>
    %256 = arith.index_cast %245 : i32 to index
    %c0_194 = arith.constant 0 : index
    %c0_195 = arith.constant 0 : index
    %257 = vector.load %arg15[%256, %c0_194, %c0_195] : memref<2x8x32xf32, #tpu.memory_space<vmem>>, vector<1x8x32xf32>
    %258 = vector.shape_cast %257 : vector<1x8x32xf32> to vector<8x32xf32>
    %259 = arith.addf %258, %249 : vector<8x32xf32>
    %260 = arith.negf %259 : vector<8x32xf32>
    %261 = math.exp %260 : vector<8x32xf32>
    %cst_196 = arith.constant 1.000000e+00 : f32
    %262 = vector.broadcast %cst_196 : f32 to vector<8x32xf32>
    %263 = arith.addf %262, %261 : vector<8x32xf32>
    %264 = arith.divf %262, %263 : vector<8x32xf32>
    %265 = arith.index_cast %245 : i32 to index
    %c0_197 = arith.constant 0 : index
    %c0_198 = arith.constant 0 : index
    %266 = vector.load %arg16[%265, %c0_197, %c0_198] : memref<2x8x32xf32, #tpu.memory_space<vmem>>, vector<1x8x32xf32>
    %267 = vector.shape_cast %266 : vector<1x8x32xf32> to vector<8x32xf32>
    %268 = arith.addf %267, %252 : vector<8x32xf32>
    %269 = arith.negf %268 : vector<8x32xf32>
    %270 = math.exp %269 : vector<8x32xf32>
    %cst_199 = arith.constant 1.000000e+00 : f32
    %271 = vector.broadcast %cst_199 : f32 to vector<8x32xf32>
    %272 = arith.addf %271, %270 : vector<8x32xf32>
    %273 = arith.divf %271, %272 : vector<8x32xf32>
    %274 = arith.index_cast %245 : i32 to index
    %c0_200 = arith.constant 0 : index
    %c0_201 = arith.constant 0 : index
    %275 = vector.load %arg17[%274, %c0_200, %c0_201] : memref<2x8x32xf32, #tpu.memory_space<vmem>>, vector<1x8x32xf32>
    %276 = vector.shape_cast %275 : vector<1x8x32xf32> to vector<8x32xf32>
    %277 = arith.mulf %264, %255 : vector<8x32xf32>
    %278 = arith.addf %276, %277 : vector<8x32xf32>
    %279 = math.tanh %278 : vector<8x32xf32>
    %cst_202 = arith.constant 1.000000e+00 : f32
    %280 = vector.broadcast %cst_202 : f32 to vector<8x32xf32>
    %281 = arith.subf %280, %273 : vector<8x32xf32>
    %282 = arith.mulf %281, %279 : vector<8x32xf32>
    %283 = arith.mulf %273, %246 : vector<8x32xf32>
    %284 = arith.addf %282, %283 : vector<8x32xf32>
    %c0_203 = arith.constant 0 : index
    %c0_204 = arith.constant 0 : index
    %285 = vector.load %arg18[%c0_203, %c0_204] : memref<8x32xf32, #tpu.memory_space<vmem>>, vector<8x32xf32>
    tpu.vector_store %arg18[%c0_203, %c0_204], %284 {strides = array<i32>} : memref<8x32xf32, #tpu.memory_space<vmem>>, vector<8x32xf32>,
    %286 = arith.index_cast %245 : i32 to index
    %287 = memref.load %arg1[%286] : memref<2xi32, #tpu.memory_space<smem>>
    %c1_i32_205 = arith.constant 1 : i32
    %288 = arith.subi %287, %c1_i32_205 : i32
    %289 = vector.broadcast %288 : i32 to vector<8x1xi32>
    %290 = arith.cmpi eq, %2, %289 : vector<8x1xi32>
    %cst_206 = arith.constant 0.000000e+00 : f32
    %291 = vector.shape_cast %290 : vector<8x1xi1> to vector<8x1xi1>
    %292 = vector.broadcast %291 : vector<8x1xi1> to vector<8x32xi1>
    %293 = vector.broadcast %cst_206 : f32 to vector<8x32xf32>
    %294 = arith.select %292, %284, %293 : vector<8x32xi1>, vector<8x32xf32>
    %cst_207 = arith.constant dense<0.000000e+00> : vector<32xf32>
    %295 = vector.multi_reduction <add>, %294, %cst_207 [0] : vector<8x32xf32> to vector<32xf32>
    %296 = vector.shape_cast %295 : vector<32xf32> to vector<1x32xf32>
    %297 = arith.index_cast %245 : i32 to index
    %c0_208 = arith.constant 0 : index
    %298 = vector.load %arg20[%297, %c0_208] : memref<2x32xf32, #tpu.memory_space<vmem>>, vector<1x32xf32>
    tpu.vector_store %arg20[%297, %c0_208], %296 {strides = array<i32>} : memref<2x32xf32, #tpu.memory_space<vmem>>, vector<1x32xf32>,
    %c2_i32_209 = arith.constant 2 : i32
    %c0_210 = arith.constant 0 : index
    %c0_211 = arith.constant 0 : index
    %299 = vector.load %arg19[%c0_210, %c0_211] : memref<2x32xf32, #tpu.memory_space<vmem>>, vector<2x32xf32>
    %c0_212 = arith.constant 0 : index
    %c0_213 = arith.constant 0 : index
    %c0_214 = arith.constant 0 : index
    %300 = vector.load %arg11[%c0_212, %c0_213, %c0_214] : memref<1x32x16xf32, #tpu.memory_space<vmem>>, vector<1x32x16xf32>
    %301 = vector.shape_cast %300 : vector<1x32x16xf32> to vector<32x16xf32>
    %cst_215 = arith.constant dense<0.000000e+00> : vector<2x16xf32>
    %302 = tpu.matmul %299, %301, %cst_215 {dimension_numbers = #tpu.dot_dimension_numbers<[1], [0], [0], [1], [0, 0, 1, 1], [], []>} : vector<2x32xf32>, vector<32x16xf32>, vector<2x16xf32> -> vector<2x16xf32>
    %c0_216 = arith.constant 0 : index
    %c0_217 = arith.constant 0 : index
    %303 = vector.load %arg20[%c0_216, %c0_217] : memref<2x32xf32, #tpu.memory_space<vmem>>, vector<2x32xf32>
    %c0_218 = arith.constant 0 : index
    %c0_219 = arith.constant 0 : index
    %c0_220 = arith.constant 0 : index
    %304 = vector.load %arg12[%c0_218, %c0_219, %c0_220] : memref<1x32x16xf32, #tpu.memory_space<vmem>>, vector<1x32x16xf32>
    %305 = vector.shape_cast %304 : vector<1x32x16xf32> to vector<32x16xf32>
    %cst_221 = arith.constant dense<0.000000e+00> : vector<2x16xf32>
    %306 = tpu.matmul %303, %305, %cst_221 {dimension_numbers = #tpu.dot_dimension_numbers<[1], [0], [0], [1], [0, 0, 1, 1], [], []>} : vector<2x32xf32>, vector<32x16xf32>, vector<2x16xf32> -> vector<2x16xf32>
    %307 = arith.addf %302, %306 : vector<2x16xf32>
    %c0_222 = arith.constant 0 : index
    %c0_223 = arith.constant 0 : index
    %c0_224 = arith.constant 0 : index
    %308 = vector.load %arg13[%c0_222, %c0_223, %c0_224] : memref<1x1x16xf32, #tpu.memory_space<vmem>>, vector<1x1x16xf32>
    %309 = vector.shape_cast %308 : vector<1x1x16xf32> to vector<1x16xf32>
    %310 = vector.broadcast %309 : vector<1x16xf32> to vector<2x16xf32>
    %311 = arith.addf %307, %310 : vector<2x16xf32>
    %c0_225 = arith.constant 0 : index
    %c0_226 = arith.constant 0 : index
    %c0_227 = arith.constant 0 : index
    %312 = vector.load %arg14[%c0_225, %c0_226, %c0_227] : memref<1x2x16xf32, #tpu.memory_space<vmem>>, vector<1x2x16xf32>
    %313 = vector.shape_cast %312 : vector<1x2x16xf32> to vector<2x16xf32>
    %314 = vector.shape_cast %311 : vector<2x16xf32> to vector<1x2x16xf32>
    tpu.vector_store %arg14[%c0_225, %c0_226, %c0_227], %314 {strides = array<i32>} : memref<1x2x16xf32, #tpu.memory_space<vmem>>, vector<1x2x16xf32>,
    return
  }
  func.func @transform_0(%arg0: i32) -> i32 {
    %c0_i32 = arith.constant 0 : i32
    %c0_i32_0 = arith.constant 0 : i32
    return %c0_i32 : i32
  }
  func.func @transform_1(%arg0: i32) -> (i32, i32, i32) {
    %c0_i32 = arith.constant 0 : i32
    %c0_i32_0 = arith.constant 0 : i32
    %c0_i32_1 = arith.constant 0 : i32
    %c0_i32_2 = arith.constant 0 : i32
    return %c0_i32, %c0_i32_0, %c0_i32_1 : i32, i32, i32
  }
  func.func @transform_2(%arg0: i32) -> (i32, i32, i32, i32) {
    %c0_i32 = arith.constant 0 : i32
    %c0_i32_0 = arith.constant 0 : i32
    %c0_i32_1 = arith.constant 0 : i32
    %c0_i32_2 = arith.constant 0 : i32
    return %arg0, %c0_i32, %c0_i32_0, %c0_i32_1 : i32, i32, i32, i32
  }
  func.func @transform_3(%arg0: i32) -> (i32, i32, i32, i32) {
    %c0_i32 = arith.constant 0 : i32
    %c0_i32_0 = arith.constant 0 : i32
    %c0_i32_1 = arith.constant 0 : i32
    %c0_i32_2 = arith.constant 0 : i32
    return %arg0, %c0_i32, %c0_i32_0, %c0_i32_1 : i32, i32, i32, i32
  }
  func.func @transform_4(%arg0: i32) -> (i32, i32, i32, i32) {
    %c0_i32 = arith.constant 0 : i32
    %c0_i32_0 = arith.constant 0 : i32
    %c0_i32_1 = arith.constant 0 : i32
    %c0_i32_2 = arith.constant 0 : i32
    return %arg0, %c0_i32, %c0_i32_0, %c0_i32_1 : i32, i32, i32, i32
  }
  func.func @transform_5(%arg0: i32) -> (i32, i32, i32, i32) {
    %c0_i32 = arith.constant 0 : i32
    %c0_i32_0 = arith.constant 0 : i32
    %c0_i32_1 = arith.constant 0 : i32
    %c0_i32_2 = arith.constant 0 : i32
    return %arg0, %c0_i32, %c0_i32_0, %c0_i32_1 : i32, i32, i32, i32
  }
  func.func @transform_6(%arg0: i32) -> (i32, i32, i32, i32) {
    %c0_i32 = arith.constant 0 : i32
    %c0_i32_0 = arith.constant 0 : i32
    %c0_i32_1 = arith.constant 0 : i32
    %c0_i32_2 = arith.constant 0 : i32
    return %arg0, %c0_i32, %c0_i32_0, %c0_i32_1 : i32, i32, i32, i32
  }
  func.func @transform_7(%arg0: i32) -> (i32, i32, i32, i32) {
    %c0_i32 = arith.constant 0 : i32
    %c0_i32_0 = arith.constant 0 : i32
    %c0_i32_1 = arith.constant 0 : i32
    %c0_i32_2 = arith.constant 0 : i32
    return %arg0, %c0_i32, %c0_i32_0, %c0_i32_1 : i32, i32, i32, i32
  }
  func.func @transform_8(%arg0: i32) -> (i32, i32, i32, i32) {
    %c0_i32 = arith.constant 0 : i32
    %c0_i32_0 = arith.constant 0 : i32
    %c0_i32_1 = arith.constant 0 : i32
    %c0_i32_2 = arith.constant 0 : i32
    return %arg0, %c0_i32, %c0_i32_0, %c0_i32_1 : i32, i32, i32, i32
  }
  func.func @transform_9(%arg0: i32) -> (i32, i32, i32, i32) {
    %c0_i32 = arith.constant 0 : i32
    %c0_i32_0 = arith.constant 0 : i32
    %c0_i32_1 = arith.constant 0 : i32
    %c0_i32_2 = arith.constant 0 : i32
    return %arg0, %c0_i32, %c0_i32_0, %c0_i32_1 : i32, i32, i32, i32
  }
  func.func @transform_10(%arg0: i32) -> (i32, i32, i32) {
    %c0_i32 = arith.constant 0 : i32
    %c0_i32_0 = arith.constant 0 : i32
    %c0_i32_1 = arith.constant 0 : i32
    return %arg0, %c0_i32, %c0_i32_0 : i32, i32, i32
  }
  func.func @transform_11(%arg0: i32) -> (i32, i32, i32) {
    %c0_i32 = arith.constant 0 : i32
    %c0_i32_0 = arith.constant 0 : i32
    %c0_i32_1 = arith.constant 0 : i32
    return %arg0, %c0_i32, %c0_i32_0 : i32, i32, i32
  }
  func.func @transform_12(%arg0: i32) -> (i32, i32, i32) {
    %c0_i32 = arith.constant 0 : i32
    %c0_i32_0 = arith.constant 0 : i32
    %c0_i32_1 = arith.constant 0 : i32
    return %arg0, %c0_i32, %c0_i32_0 : i32, i32, i32
  }
  func.func @transform_13(%arg0: i32) -> (i32, i32, i32) {
    %c0_i32 = arith.constant 0 : i32
    %c0_i32_0 = arith.constant 0 : i32
    %c0_i32_1 = arith.constant 0 : i32
    return %arg0, %c0_i32, %c0_i32_0 : i32, i32, i32
  }
}

</mosaic_0001>

<bundles_post_ra>
// kernel: tpu_custom_call.1
= control target key start
LH: loop header
LB: loop body
LE: loop exit
PB: predicated region body
PF: predicated region fallthrough
CT: control target
= control target key end

     0   :  { %s2863_s0 = inlined_call_operand.vmem [shape: s32[2], index: 0, kind: input, shape index: {}]   ;;  %s2864_s1 = inlined_call_operand.vmem [shape: f32[2,8,32], index: 1, kind: input, shape index: {}]   ;;  %s2865_s2 = inlined_call_operand.hbm [shape: f32[2,3,32,32], index: 2, kind: input, shape index: {}]   ;;  %s2866_s3 = inlined_call_operand.hbm [shape: f32[2,3,32,32], index: 3, kind: input, shape index: {}]   ;;  %s2867_s4 = inlined_call_operand.vmem [shape: f32[2,3,1,32], index: 4, kind: input, shape index: {}]   ;;  %s2868_s5 = inlined_call_operand.vmem [shape: f32[2,3,1,32], index: 5, kind: input, shape index: {}]   ;;  %s2869_s6 = inlined_call_operand.hbm [shape: f32[2,3,32,32], index: 6, kind: input, shape index: {}]   ;;  %s2870_s7 = inlined_call_operand.hbm [shape: f32[2,3,32,32], index: 7, kind: input, shape index: {}]   ;;  %s2871_s8 = inlined_call_operand.vmem [shape: f32[2,3,1,32], index: 8, kind: input, shape index: {}]   ;;  %s2872_s9 = inlined_call_operand.vmem [shape: f32[2,3,1,32], index: 9, kind: input, shape index: {}]   ;;  %s2873_s10 = inlined_call_operand.vmem [shape: f32[2,32,16], index: 10, kind: input, shape index: {}]   ;;  %s2874_s11 = inlined_call_operand.vmem [shape: f32[2,32,16], index: 11, kind: input, shape index: {}]   ;;  %s2875_s12 = inlined_call_operand.vmem [shape: f32[2,1,16], index: 12, kind: input, shape index: {}]   ;;  %s2876_s13 = inlined_call_operand.hbm [shape: f32[2,2,16], index: 13, kind: output, shape index: {}]  }
   0x1   :  { %2891 = sst [smem:[#allocation31_spill]] %s2863_s0 }
   0x2   :  { %2892 = sst [smem:[#allocation32_spill]] %s2865_s2 }
   0x3   :  { %2893 = sst [smem:[#allocation33_spill]] %s2866_s3 }
   0x4   :  { %2894 = sst [smem:[#allocation34_spill]] %s2872_s9 }
   0x5   :  { %2895 = sst [smem:[#allocation35_spill]] %s2873_s10 }
   0x6   :  { %2896 = sst [smem:[#allocation36_spill]] %s2874_s11 }
   0x7   :  { %2897 = sst [smem:[#allocation37_spill]] %s2875_s12 }
   0x8   :  { %2898 = sst [smem:[#allocation38_spill]] %s2876_s13 }
   0x9   :  { %18 = vsyncpa [#allocation11], 0 }
   0xa   :  { %19 = vsyncpa [#allocation9], 0 }
   0xb   :  { %21 = vsyncpa [#allocation9 + $0x1], 0 }
   0xc   :  { %22 = vsyncpa [#allocation14], 0 }
   0xd   :  { %24 = vsyncpa [#allocation14 + $0x1], 0 }
   0xe   :  { %25 = vsyncpa [#allocation17], 0 }
   0xf   :  { %27 = vsyncpa [#allocation17 + $0x1], 0 }
  0x10   :  { %28 = vsyncpa [#allocation10], 0 }
  0x11   :  { %30 = vsyncpa [#allocation10 + $0x1], 0  ;;  %s2355_s25 = smov 0   ;;  %s2357_s26 = smov 0  }
  0x12   :  { %s2359_s27 = smov 0   ;;  %s2361_s28 = smov 0  }
  0x13 LB: > { %2899 = sst [smem:[#allocation24_spill]] %s2267_s25  ;;  %s2376_s29 = sadd.s32 1, %s2279_s28   ;;  %s2279_s28 = sphi %s2361_s28, %s2926_s28   ;;  %s2275_s27 = sphi %s2359_s27, %s2928_s27   ;;  %s2271_s26 = sphi %s2357_s26, %s2930_s26   ;;  %s2267_s25 = sphi %s2355_s25, %s2929_s25  }
  0x14   : > { %2900 = sst [smem:[#allocation25_spill]] %s2275_s27  ;;  %s85_s30 = sadd.s32 1, %s2275_s27 }
  0x15   : > { %2901 = sst [smem:[#allocation26_spill]] %s2279_s28  ;;  %s82_s14 = ssub.s32 %s2279_s28, %s2376_s29 }
  0x16   : > { %2902 = sst [smem:[#allocation27_spill]] %s2376_s29  ;;  %p92_p0 = scmp.ne.s32.totalorder %s2275_s27, %s2271_s26 }
  0x17   : > { %p83_p1 = scmp.eq.s32.totalorder %s82_s14, 0  ;;  %p93_p2 = scmp.eq.s32.totalorder %s2279_s28, 0 }
  0x18   : > { %p1974_p4 = scmp.lt.s32.totalorder %s2279_s28, 2  ;;  %s2393_s16 = sand.u32 1, %s2275_s27  }
  0x19   : > { %s2387_s15 = scalar_select %p83_p1, %s2275_s27, %s85_s30  }
  0x1a   : > { %p94_p5 = por %p93_p2, %p92_p0  ;;  %s2396_s17 = smul.u32 96, %s2393_s16 }
  0x1b   : > { %2903 = sst [smem:[#allocation28_spill]] %s2387_s15  ;;  %s2399_s18 = smul.u32 96, %s2279_s28 }
  0x1c   : > { %p2401_p6 = pnand %p1974_p4, %p94_p5  ;;  %s443_s20 = sand.u32 1, %s2279_s28  }
  0x1d   : > { %s2905_s3 = sld [smem:[#allocation33_spill]]  ;;  %s447_s30 = scalar_lea.vmem [#allocation13], %s2396_s17 }
  0x1e   : > { %s455_s14 = sshll.u32 %s447_s30, 4  ;;  %s2411_s15 = scalar_lea.sflag [#allocation14], %s443_s20  ;;  %s456_s14 = int_to_ptr.vmem [resolvable:$true] %s455_s14 }
  0x1f   : > { %p2070_p8 = pneg %p2401_p6 }
  0x23   : > { %s452_s23 = scalar_lea.hbm %s2905_s3, %s2399_s18  ;;  %s2073_s22 = scalar_lea.hbm %s2905_s3, 192 }
  0x24   : > { %s453_s24 = sshll.u32 %s452_s23, 4  ;;  %s454_s24 = int_to_ptr.hbm [resolvable:$true] %s453_s24 }
  0x25   : > { %s2066_s29 = sshra.s32 %s454_s24, 4  ;;  %s2067_s29 = int_to_ptr.hbm [resolvable:$true] %s2066_s29 }
  0x26   : > { %s2068_s13 = scalar_lea.hbm %s2067_s29, 96  ;;  %p2074_p11 = scmp.lt.s32.totalorder %s2067_s29, %s2905_s3 }
  0x27   : > { %p2069_p7 = scmp.ne.s32.totalorder %s2067_s29, %s2068_s13  ;;  %p2075_p12 = scmp.lt.s32.totalorder %s2073_s22, %s2068_s13 }
  0x29   : > { %p2071_p9 = pnand %p2070_p8, %p2069_p7  ;;  %p2076_p13 = por %p2075_p12, %p2074_p11 }
  0x2b   : > { %p2072_p10 = pneg %p2071_p9 }
  0x2d   : > { %p2077_p1 = pnand %p2076_p13, %p2072_p10 }
  0x2f   : > { %2080 = shalt.err (!%p2077_p1)
}
  0x30   : > { %s2880_s20 = smov 128   ;;  %s2882_s11 = smov 8  }
  0x31   : > { %1962 = dma.hbm_to_vmem [thread:$0]  (!%p2401_p6), %s454_s24, 1536, %s456_s14, %s2411_s15, %s2880_s20, %s2880_s20, %s2882_s11  }
  0x32   : > { %s2431_s13 = sadd.s32 4294967295, %s2279_s28   ;;  %s1827_s29 = sadd.s32 4294967294, %s2279_s28  }
  0x33   : > { %p98_p2 = scmp.ne.s32.totalorder %s2271_s26, %s2267_s25  ;;  %p99_p4 = scmp.eq.s32.totalorder %s2431_s13, 0 }
  0x34   : > { %p382_p5 = scmp.eq.s32.totalorder %s2431_s13, 1  ;;  %p388_p7 = scmp.eq.s32.totalorder %s1827_s29, 1 }
  0x35   : > { %p2440_p9 = por %p99_p4, %p98_p2  ;;  %p1828_p10 = scmp.ge.s32.totalorder %s2279_s28, 1 }
  0x36   : > { %p2448_p11 = por %p382_p5, %p92_p0  ;;  %p2452_p12 = por %p388_p7, %p98_p2 }
  0x37   : > { %p395_p13 = scmp.lt.s32.totalorder %s2279_s28, 3  ;;  %s2911_s0 = sld [smem:[#allocation31_spill]] }
  0x38   : > { %s2907_s24 = scalar_select %p2448_p11, 1, 0 }
  0x39   : > { %s2909_s14 = scalar_select %p2452_p12, 1, 0 }
  0x3a   : > { %2908 = sst [smem:[#allocation29_spill]] %s2907_s24  ;;  %p2460_p1 = pnand %p1828_p10, %p395_p13 }
  0x3b   : > { %2910 = sst [smem:[#allocation30_spill]] %s2909_s14  ;;  %s425_s14 = scalar_lea.vmem [#allocation12], %s2396_s17 }
  0x3c   : > { %p1952_p0 = pneg %p2460_p1  ;;  %s2913_s2 = sld [smem:[#allocation32_spill]] }
  0x3d   : > { %s407_s30 = sshll.u32 %s2911_s0, 4  ;;  %s433_s28 = sshll.u32 %s425_s14, 4  ;;  %s408_s30 = int_to_ptr.vmem [resolvable:$true] %s407_s30  ;;  %s434_s28 = int_to_ptr.vmem [resolvable:$true] %s433_s28 }
  0x3e   : > { %p1953_p2 = pnand %p1952_p0, %p99_p4  ;;  %s488_s0 = scalar_lea.hbm %s2869_s6, %s2399_s18 }
  0x3f   : > { %s2283_s25 = smov [#allocation8]   ;;  %s422_s24 = scalar_lea.sflag [#allocation9], %s2393_s16 }
  0x40   : > { %1955 = dma.vmem_to_smem (!%p1953_p2), %s408_s30, 16, %s2283_s25, [#allocation11]  }
  0x42   : > { %s430_s3 = scalar_lea.hbm %s2913_s2, %s2399_s18  ;;  %s2118_s11 = scalar_lea.hbm %s2913_s2, 192 }
  0x43   : > { %s431_s27 = sshll.u32 %s430_s3, 4  ;;  %s432_s27 = int_to_ptr.hbm [resolvable:$true] %s431_s27 }
  0x44   : > { %s2111_s12 = sshra.s32 %s432_s27, 4  ;;  %s2112_s12 = int_to_ptr.hbm [resolvable:$true] %s2111_s12 }
  0x45   : > { %s2113_s10 = scalar_lea.hbm %s2112_s12, 96  ;;  %p2119_p13 = scmp.lt.s32.totalorder %s2112_s12, %s2913_s2 }
  0x46   : > { %p2114_p5 = scmp.ne.s32.totalorder %s2112_s12, %s2113_s10  ;;  %p2120_p0 = scmp.lt.s32.totalorder %s2118_s11, %s2113_s10 }
  0x48   : > { %p2116_p7 = pnand %p2114_p5, %p2070_p8  ;;  %p2121_p3 = por %p2120_p0, %p2119_p13 }
  0x4a   : > { %p2117_p10 = pneg %p2116_p7 }
  0x4c   : > { %p2122_p2 = pnand %p2121_p3, %p2117_p10 }
  0x4e   : > { %2125 = shalt.err (!%p2122_p2)
}
  0x4f   : > { %s2914_s25 = smov 8   ;;  %s2915_s30 = smov 128  }
  0x50   : > { %1959 = dma.hbm_to_vmem [thread:$0]  (!%p2401_p6), %s432_s27, 1536, %s434_s28, %s422_s24, %s2915_s30, %s2915_s30, %s2914_s25  }
  0x51   : > { %s489_s22 = sshll.u32 %s488_s0, 4  ;;  %s483_s23 = scalar_lea.vmem [#allocation15], %s2396_s17  ;;  %s490_s22 = int_to_ptr.hbm [resolvable:$true] %s489_s22 }
  0x52   : > { %s491_s3 = sshll.u32 %s483_s23, 4  ;;  %s2141_s20 = sshra.s32 %s490_s22, 4  ;;  %s492_s3 = int_to_ptr.vmem [resolvable:$true] %s491_s3  ;;  %s2142_s20 = int_to_ptr.hbm [resolvable:$true] %s2141_s20 }
  0x53   : > { %s2143_s9 = scalar_lea.hbm %s2142_s20, 96  ;;  %s2148_s11 = scalar_lea.hbm %s2869_s6, 192 }
  0x54   : > { %p2144_p5 = scmp.ne.s32.totalorder %s2142_s20, %s2143_s9  ;;  %p2149_p10 = scmp.lt.s32.totalorder %s2142_s20, %s2869_s6 }
  0x55   : > { %p2150_p13 = scmp.lt.s32.totalorder %s2148_s11, %s2143_s9 }
  0x56   : > { %p2146_p3 = pnand %p2144_p5, %p2070_p8 }
  0x57   : > { %p2151_p0 = por %p2150_p13, %p2149_p10 }
  0x58   : > { %p2147_p7 = pneg %p2146_p3 }
  0x5a   : > { %p2152_p2 = pnand %p2151_p0, %p2147_p7 }
  0x5c   : > { %2155 = shalt.err (!%p2152_p2)
}
  0x5d   : > { %1965 = dma.hbm_to_vmem [thread:$0]  (!%p2401_p6), %s490_s22, 1536, %s492_s3, %s2411_s15, %s2915_s30, %s2915_s30, %s2914_s25  }
  0x5e   : > { %s510_s2 = scalar_lea.hbm %s2870_s7, %s2399_s18  ;;  %s505_s28 = scalar_lea.vmem [#allocation16], %s2396_s17 }
  0x5f   : > { %s513_s24 = sshll.u32 %s505_s28, 4  ;;  %s511_s23 = sshll.u32 %s510_s2, 4  ;;  %s514_s24 = int_to_ptr.vmem [resolvable:$true] %s513_s24  ;;  %s512_s23 = int_to_ptr.hbm [resolvable:$true] %s511_s23 }
  0x60   : > { %s502_s20 = scalar_lea.sflag [#allocation17], %s2393_s16  ;;  %s2171_s9 = sshra.s32 %s512_s23, 4  ;;  %s2172_s9 = int_to_ptr.hbm [resolvable:$true] %s2171_s9 }
  0x61   : > { %s2173_s10 = scalar_lea.hbm %s2172_s9, 96  ;;  %s2178_s22 = scalar_lea.hbm %s2870_s7, 192 }
  0x62   : > { %p2174_p5 = scmp.ne.s32.totalorder %s2172_s9, %s2173_s10  ;;  %p2179_p10 = scmp.lt.s32.totalorder %s2172_s9, %s2870_s7 }
  0x63   : > { %p2180_p13 = scmp.lt.s32.totalorder %s2178_s22, %s2173_s10 }
  0x64   : > { %p2176_p3 = pnand %p2174_p5, %p2070_p8 }
  0x65   : > { %p2181_p0 = por %p2180_p13, %p2179_p10 }
  0x66   : > { %p2177_p7 = pneg %p2176_p3 }
  0x68   : > { %p2182_p2 = pnand %p2181_p0, %p2177_p7 }
  0x6a   : > { %2185 = shalt.err (!%p2182_p2)
}
  0x6b   : > { %1968 = dma.hbm_to_vmem [thread:$0]  (!%p2401_p6), %s512_s23, 1536, %s514_s24, %s502_s20, %s2915_s30, %s2915_s30, %s2914_s25  }
  0x6c   : > { %561 = sbr.rel (%p2460_p1) target bundleno = 1021 (0x3fd), region = 72 }
  0x71   : > { %2246 = dma.done.wait (%p99_p4), [#allocation11], 16  }
  0x72   : > { %2248 = vsyncadd (%p99_p4), [#allocation11], 4294967280  ;;  %s2535_s16 = sand.u32 1, %s2271_s26  }
  0x73   : > { %s1936_s17 = smul.u32 96, %s2535_s16  ;;  %s569_s19 = scalar_lea.sflag [#allocation9], %s2535_s16 }
  0x75   : > { %s2539_s11 = scalar_lea.vmem [#allocation12], %s1936_s17 }
  0x76   : > { %2250 = dma.done.wait (%p2440_p9), %s569_s19, 1536  }
  0x77   : > { %2252 = vsyncadd (%p2440_p9), %s569_s19, 4294965760  ;;  %s578_s29 = sand.u32 1, %s2431_s13   ;;  %s2546_s30 = scalar_lea.vmem [#allocation13], %s1936_s17 }
  0x78   : > { %s579_s25 = scalar_lea.sflag [#allocation14], %s578_s29 }
  0x79   : > { %2254 = dma.done.wait (%p2440_p9), %s579_s25, 3072  }
  0x7a   : > { %2256 = vsyncadd (%p2440_p9), %s579_s25, 4294964224  ;;  %s2552_s14 = scalar_lea.vmem [#allocation15], %s1936_s17  ;;  %s599_s0 = scalar_lea.sflag [#allocation17], %s2535_s16 }
  0x7b   : > { %s2555_s27 = scalar_lea.vmem [#allocation16], %s1936_s17 }
  0x7c   : > { %2258 = dma.done.wait (%p2440_p9), %s599_s0, 1536  }
  0x7d   : > { %2260 = vsyncadd (%p2440_p9), %s599_s0, 4294965760 }
  0x7e   : > { %608 = sfence }
  0x7f   : > { %v727_v0 = vld [vmem:[%s2539_s11 + $0x18] sm:$0xff]  ;;  %v726_v2 = vld [vmem:[%s2539_s11 + $0x10] sm:$0xff]  ;;  %vm732_vm0 = vcmask 261120   ;;  %p691_p6 = scmp.lt.s32.totalorder %s2431_s13, 1  ;;  %v2284_v4 = vmov 0.0   ;;  %v725_v5 = vld [vmem:[%s2539_s11 + $0x8] sm:$0xff] }
  0x80   : > { %v837_v1 = vld [vmem:[%s2546_s30 + $0x18] sm:$0xff]  ;;  %751 = vmatpush.msra.mxu0 %v727_v0  ;;  %v836_v3 = vld [vmem:[%s2546_s30 + $0x10] sm:$0xff]  ;;  %853 = vst.msk [vmem:[#allocation5] sm:$0xff] %vm732_vm0, %v2284_v4  ;;  %v835_v6 = vld [vmem:[%s2546_s30 + $0x8] sm:$0xff]  ;;  %s978_s18 = sld [smem:[#allocation8]]  ;;  %vm992_vm10 = vcmask 253952  }
  0x81   : > { %873 = vmatpush.msra.mxu3 %v837_v1  ;;  %v1847_v7 = vld [vmem:[%s2539_s11 + $0x38] sm:$0xff]  ;;  %s2572_s21 = scalar_select %p691_p6, %s2431_s13, 1  ;;  %v1846_v8 = vld [vmem:[%s2539_s11 + $0x30] sm:$0xff]  ;;  %v724_v9 = vld [vmem:[%s2539_s11] sm:$0xff] }
  0x82   : > { %752 = vmatpush.msra.mxu0 %v726_v2  ;;  %786 = vmatpush.msra.mxu1 %v1847_v7  ;;  %v834_v10 = vld [vmem:[%s2546_s30] sm:$0xff]  ;;  %v1861_v12 = vld [vmem:[%s2546_s30 + $0x38] sm:$0xff]  ;;  %v1845_v14 = vld [vmem:[%s2539_s11 + $0x28] sm:$0xff]  ;;  %s2713_s25 = sld [smem:[#allocation8 + $0x1]] }
  0x83   : > { %874 = vmatpush.msra.mxu3 %v836_v3  ;;  %s2578_s2 = smul.u32 3, %s2572_s21  ;;  %v2583_v11 = vld [vmem:[%s2864_s1] sm:$0xff]  ;;  %v1854_v13 = vld [vmem:[%s2539_s11 + $0x58] sm:$0xff]  ;;  %v1860_v15 = vld [vmem:[%s2546_s30 + $0x30] sm:$0xff]  ;;  %s2916_s28 = sld [smem:[#allocation34_spill]] }
  0x84   : > { %753 = vmatpush.msra.mxu0 %v725_v5  ;;  %787 = vmatpush.msra.mxu1 %v1846_v8  ;;  %v1853_v16 = vld [vmem:[%s2539_s11 + $0x50] sm:$0xff]  ;;  %v1844_v18 = vld [vmem:[%s2539_s11 + $0x20] sm:$0xff]  ;;  %v1865_v19 = vld [vmem:[%s2546_s30 + $0x58] sm:$0xff]  ;;  %s2917_s20 = sld [smem:[#allocation35_spill]] }
  0x85   : > { %875 = vmatpush.msra.mxu3 %v835_v6  ;;  %821 = vmatpush.msra.mxu2 %v1854_v13  ;;  %s2600_s9 = scalar_lea.vmem %s2867_s4, %s2578_s2  ;;  %v1859_v20 = vld [vmem:[%s2546_s30 + $0x28] sm:$0xff]  ;;  %v1864_v22 = vld [vmem:[%s2546_s30 + $0x50] sm:$0xff]  ;;  %v1858_v23 = vld [vmem:[%s2546_s30 + $0x20] sm:$0xff]  ;;  %s2614_s15 = scalar_lea.vmem %s2868_s5, %s2578_s2 }
  0x86   : > { %754 = vmatpush.msra.mxu0 %v724_v9  ;;  %788 = vmatpush.msra.mxu1 %v1845_v14  ;;  %v1852_v21 = vld [vmem:[%s2539_s11 + $0x48] sm:$0xff]  ;;  %v1851_v24 = vld [vmem:[%s2539_s11 + $0x40] sm:$0xff]  ;;  %s1873_s17 = sadd.s32 4294967295, %s978_s18  ;;  %s2682_s29 = scalar_lea.vmem %s2871_s8, %s2578_s2 }
  0x87   : > { %876 = vmatpush.msra.mxu3 %v834_v10  ;;  %1842 = vmatmul.msk.f32.vlgmr.msra.gmra.mxu0 %vm732_vm0, %v2583_v11  ;;  %v2592_v17 = vld [vmem:[#allocation5] sm:$0xff]  ;;  %v1863_v25 = vld [vmem:[%s2546_s30 + $0x48] sm:$0xff]  ;;  %v1862_v27 = vld [vmem:[%s2546_s30 + $0x40] sm:$0xff]  ;;  %s1837_s11 = sshll.u32 %s2535_s16, 1  ;;  %s2920_s0 = sld [smem:[#allocation38_spill]] }
  0x88   : > { %1868 = vmatmul.msk.f32.vlgmr.msra.gmra.mxu3 %vm732_vm0, %v2592_v17  ;;  %822 = vmatpush.msra.mxu2 %v1853_v16  ;;  %v2621_v26 = vld [vmem:[%s2864_s1 + $0x8] sm:$0xff]  ;;  %v2013_v28 = vld [vmem:[%s2600_s9] ss:$0 sm:$0xff]  ;;  %v2014_v31 = vld [vmem:[%s2600_s9 + $0x1] ss:$0 sm:$0xff]  ;;  %s1880_s23 = sadd.s32 4294967295, %s2713_s25 }
  0x89   : > { %896 = vmatpush.msrb.mxu3 %v1861_v12  ;;  %789 = vmatpush.msra.mxu1 %v1844_v18  ;;  %v2640_v33 = vld [vmem:[%s2614_s15] ss:$0 sm:$0xff]  ;;  %v2017_v41 = vld [vmem:[%s2600_s9 + $0x2] ss:$0 sm:$0xff]  ;;  %v2647_v42 = vld [vmem:[%s2614_s15 + $0x1] ss:$0 sm:$0xff]  ;;  %s2729_s24 = scalar_lea.vmem %s2916_s28, %s2578_s2 }
  0x8a   : > { %919 = vmatpush.msrb.mxu0 %v1865_v19  ;;  %1849 = vmatmul.msk.f32.vlgmr.msra.gmra.mxu1 %vm732_vm0, %v2583_v11  ;;  %v2652_v57 = vld [vmem:[%s2614_s15 + $0x2] ss:$0 sm:$0xff]  ;;  %s2918_s15 = sld [smem:[#allocation37_spill]] }
  0x8b   : > { %897 = vmatpush.msrb.mxu3 %v1860_v15  ;;  %823 = vmatpush.msra.mxu2 %v1852_v21 }
  0x8c   : > { %920 = vmatpush.msrb.mxu0 %v1864_v22  ;;  %1010 = vmatpush.msrb.mxu1 %v837_v1 }
  0x8d   : > { %898 = vmatpush.msrb.mxu3 %v1859_v20  ;;  %824 = vmatpush.msra.mxu2 %v1851_v24 }
  0x8e   : > { %921 = vmatpush.msrb.mxu0 %v1863_v25  ;;  %1856 = vmatmul.msk.f32.vlgmr.msra.gmra.mxu2 %vm732_vm0, %v2583_v11 }
  0x8f   : > { %899 = vmatpush.msrb.mxu3 %v1858_v23  ;;  %1843 = vmatmul.msk.f32.gmra.mxu0 %vm732_vm0, %v2621_v26 }
  0x90   : > { %1869 = vmatmul.msk.f32.vlgmr.msrb.gmra.mxu3 %vm732_vm0, %v2592_v17  ;;  %922 = vmatpush.msrb.mxu0 %v1862_v27  ;;  %s719_s22 = scalar_lea.vmem %s2918_s15, %s2572_s21 }
  0x91   : > { %1030 = vmatpush.msrb.mxu2 %v1861_v12  ;;  %1011 = vmatpush.msrb.mxu1 %v836_v3 }
  0x92   : > { %1050 = vmatpush.msra.mxu3 %v1865_v19  ;;  %1850 = vmatmul.msk.f32.gmra.mxu1 %vm732_vm0, %v2621_v26 }
  0x93   : > { %1031 = vmatpush.msrb.mxu2 %v1860_v15  ;;  %1012 = vmatpush.msrb.mxu1 %v835_v6 }
  0x94   : > { %1051 = vmatpush.msra.mxu3 %v1864_v22  ;;  %v722_v22 = vlaneseq }
  0x95   : > { %1032 = vmatpush.msrb.mxu2 %v1859_v20  ;;  %1013 = vmatpush.msrb.mxu1 %v834_v10 }
  0x96   : > { %1052 = vmatpush.msra.mxu3 %v1863_v25  ;;  %1857 = vmatmul.msk.f32.gmra.mxu2 %vm732_vm0, %v2621_v26  ;;  %v2657_v25 = vshrl.u32 %v722_v22, 7 }
  0x97   : > { %1870 = vmatmul.msk.f32.vlgmr.msrb.gmra.mxu0 %vm732_vm0, %v2592_v17  ;;  %1033 = vmatpush.msrb.mxu2 %v1858_v23 }
  0x98   : > { %1053 = vmatpush.msra.mxu3 %v1862_v27 }
 0x104   : > { %v756_v29 = vpop.f32.mrf.mxu0 }
 0x105   : > { %v757_v30 = vadd.f32 %v2013_v28, %v756_v29 }
 0x107   : > { %762 = vst.msk [vmem:[#allocation2] sm:$0xff] %vm732_vm0, %v757_v30  ;;  %v791_v32 = vpop.f32.mrf.mxu1 }
 0x108   : > { %v792_v34 = vadd.f32 %v2014_v31, %v791_v32 }
 0x10a   : > { %797 = vst.msk [vmem:[#allocation3] sm:$0xff] %vm732_vm0, %v792_v34 }
 0x10b   : > { %v878_v35 = vpop.f32.mrf.mxu3 }
 0x10c   : > { %v879_v36 = vadd.f32 %v2640_v33, %v878_v35  ;;  %v759_v37 = vpop.f32.mrf.mxu0 }
 0x10d   : > { %v760_v38 = vadd.f32 %v2013_v28, %v759_v37  ;;  %v2659_v28 = vstv %s1873_s17  ;;  %s2919_s17 = sld [smem:[#allocation36_spill]] }
 0x10e   : > { %v927_v39 = vld [vmem:[#allocation2] sm:$0xff]  ;;  %vm981_vm9 = vcmp.eq.s32.totalorder %v2657_v25, %v2659_v28 }
 0x10f   : > { %v928_v40 = vadd.f32 %v927_v39, %v879_v36  ;;  %763 = vst.msk [vmem:[#allocation2 + $0x8] sm:$0xff] %vm732_vm0, %v760_v38  ;;  %v794_v5 = vpop.f32.mrf.mxu1 }
 0x110   : > { %v795_v8 = vadd.f32 %v2014_v31, %v794_v5 }
 0x111   : > { %v1871_v43 = vmul.f32 -1.442695, %v928_v40  ;;  %v826_v44 = vpop.f32.mrf.mxu2  ;;  %v948_v46 = vld [vmem:[#allocation3] sm:$0xff] }
 0x112   : > { %v827_v47 = vadd.f32 %v2017_v41, %v826_v44  ;;  %798 = vst.msk [vmem:[#allocation3 + $0x8] sm:$0xff] %vm732_vm0, %v795_v8 }
 0x113   : > { %2026 = vpow2.f32 %v1871_v43  ;;  %v901_v45 = vpop.f32.mrf.mxu3 }
 0x114   : > { %v902_v48 = vadd.f32 %v2647_v42, %v901_v45  ;;  %832 = vst.msk [vmem:[#allocation4] sm:$0xff] %vm732_vm0, %v827_v47  ;;  %v924_v59 = vpop.f32.mrf.mxu0 }
 0x115   : > { %v925_v0 = vadd.f32 %v2652_v57, %v924_v59  ;;  %v1233_v59 = vld [vmem:[%s2555_s27 + $0x18] sm:$0xff] }
 0x116   : > { %v949_v49 = vadd.f32 %v948_v46, %v902_v48  ;;  %v1059_v45 = vld [vmem:[#allocation2 + $0x8] sm:$0xff]  ;;  %1269 = vmatpush.msrb.mxu3 %v1233_v59 }
 0x118   : > { %v1872_v50 = vmul.f32 -1.442695, %v949_v49 }
 0x119   : > { %v2027_v51 = vpop.eup %2026  ;;  %v829_v6 = vpop.f32.mrf.mxu2 }
 0x11a   : > { %v932_v52 = vadd.f32 1.0, %v2027_v51  ;;  %2028 = vpow2.f32 %v1872_v50  ;;  %v830_v9 = vadd.f32 %v2017_v41, %v829_v6  ;;  %v1081_v50 = vld [vmem:[#allocation3 + $0x8] sm:$0xff] }
 0x11b   : > { %v969_v13 = vld [vmem:[#allocation4] sm:$0xff]  ;;  %v1130_v51 = vld [vmem:[%s2552_s14 + $0x18] sm:$0xff] }
 0x11c   : > { %2030 = vrcp.f32 %v932_v52  ;;  %v944_v60 = vand.u32 2147483648, %v932_v52  ;;  %v942_v62 = vand.u32 2147483647, %v932_v52  ;;  %vm938_vm2 = vweird.f32 %v932_v52  ;;  %833 = vst.msk [vmem:[#allocation4 + $0x8] sm:$0xff] %vm732_vm0, %v830_v9  ;;  %1147 = vmatpush.msra.mxu0 %v1130_v51  ;;  %v1230_v6 = vld [vmem:[%s2555_s27] sm:$0xff]  ;;  %v1900_v9 = vld [vmem:[%s2555_s27 + $0x38] sm:$0xff] }
 0x11e   : > { %v945_v3 = vor.u32 1.1754944e-38, %v944_v60  ;;  %vm943_vm4 = vcmp.eq.f32.partialorder %v942_v62, 8.507059e+37  ;;  %v1885_v60 = vld [vmem:[%s2552_s14 + $0x30] sm:$0xff] }
 0x120   : > { %v2029_v53 = vpop.eup %2028 }
 0x121   : > { %v953_v54 = vadd.f32 1.0, %v2029_v53  ;;  %v1129_v53 = vld [vmem:[%s2552_s14 + $0x10] sm:$0xff] }
 0x122   : > { %v2031_v55 = vpop.eup %2030  ;;  %1148 = vmatpush.msra.mxu0 %v1129_v53 }
 0x123   : > { %2032 = vrcp.f32 %v953_v54  ;;  %v934_v56 = vmul.f32 %v2031_v55, %v932_v52  ;;  %vm939_vm1 = vweird.f32 %v2031_v55  ;;  %v965_v14 = vand.u32 2147483648, %v953_v54 }
 0x124   : > { %vm940_vm3 = vmor %vm938_vm2, %vm939_vm1  ;;  %v963_v18 = vand.u32 2147483647, %v953_v54  ;;  %vm959_vm6 = vweird.f32 %v953_v54 }
 0x125   : > { %v935_v58 = vsub.f32 1.0, %v934_v56  ;;  %v966_v21 = vor.u32 1.1754944e-38, %v965_v14 }
 0x126   : > { %vm964_vm8 = vcmp.eq.f32.partialorder %v963_v18, 8.507059e+37 }
 0x127   : > { %v936_v61 = vmul.f32 %v2031_v55, %v935_v58  ;;  %v1127_v58 = vld [vmem:[%s2552_s14] sm:$0xff] }
 0x129   : > { %v2033_v63 = vpop.eup %2032  ;;  %v937_v1 = vadd.f32 %v2031_v55, %v936_v61 }
 0x12a   : > { %v955_v2 = vmul.f32 %v2033_v63, %v953_v54  ;;  %vm960_vm5 = vweird.f32 %v2033_v63 }
 0x12b   : > { %v941_v7 = vsel %vm940_vm3, %v2031_v55, %v937_v1  ;;  %vm961_vm7 = vmor %vm959_vm6, %vm960_vm5  ;;  %v1128_v55 = vld [vmem:[%s2552_s14 + $0x8] sm:$0xff] }
 0x12c   : > { %v956_v10 = vsub.f32 1.0, %v955_v2  ;;  %v946_v12 = vsel %vm943_vm4, %v945_v3, %v941_v7  ;;  %1149 = vmatpush.msra.mxu0 %v1128_v55  ;;  %v1231_v2 = vld [vmem:[%s2555_s27 + $0x8] sm:$0xff]  ;;  %v1883_v3 = vld [vmem:[%s2552_s14 + $0x20] sm:$0xff] }
 0x12d   : > { %v970_v15 = vmul.f32 %v946_v12, %v925_v0  ;;  %v1884_v0 = vld [vmem:[%s2552_s14 + $0x28] sm:$0xff] }
 0x12e   : > { %v957_v16 = vmul.f32 %v2033_v63, %v956_v10  ;;  %1150 = vmatpush.msra.mxu0 %v1127_v58 }
 0x12f   : > { %v971_v19 = vadd.f32 %v970_v15, %v969_v13  ;;  %1881 = vmatmul.msk.f32.vlgmr.msra.gmra.mxu0 %vm732_vm0, %v2583_v11  ;;  %v1899_v15 = vld [vmem:[%s2555_s27 + $0x30] sm:$0xff] }
 0x130   : > { %v958_v20 = vadd.f32 %v2033_v63, %v957_v16 }
 0x131   : > { %2034 = vtanh.f32 %v971_v19 }
 0x132   : > { %v962_v23 = vsel %vm961_vm7, %v2033_v63, %v958_v20  ;;  %v1232_v63 = vld [vmem:[%s2555_s27 + $0x10] sm:$0xff]  ;;  %v1898_v20 = vld [vmem:[%s2555_s27 + $0x28] sm:$0xff] }
 0x133   : > { %v967_v24 = vsel %vm964_vm8, %v966_v21, %v962_v23  ;;  %1270 = vmatpush.msrb.mxu3 %v1232_v63  ;;  %v1897_v21 = vld [vmem:[%s2555_s27 + $0x20] sm:$0xff] }
 0x134   : > { %v973_v27 = vsub.f32 1.0, %v967_v24  ;;  %v975_v31 = vmul.f32 %v967_v24, %v2592_v17 }
 0x135   : > { %1271 = vmatpush.msrb.mxu3 %v1231_v2 }
 0x137   : > { %v2035_v29 = vpop.eup %2034  ;;  %1882 = vmatmul.msk.f32.gmra.mxu0 %vm732_vm0, %v2621_v26  ;;  %1272 = vmatpush.msrb.mxu3 %v1230_v6 }
 0x138   : > { %v974_v30 = vmul.f32 %v2035_v29, %v973_v27  ;;  %v1893_v27 = vld [vmem:[%s2552_s14 + $0x58] sm:$0xff] }
 0x139   : > { %1217 = vmatpush.msra.mxu2 %v1893_v27 }
 0x13a   : > { %v976_v32 = vadd.f32 %v975_v31, %v974_v30 }
 0x13c   : > { %977 = vst.msk [vmem:[#allocation5] sm:$0xff] %vm732_vm0, %v976_v32  ;;  %v984_v34 = vsel %vm981_vm9, %v976_v32, 0.0  ;;  %v1892_v32 = vld [vmem:[%s2552_s14 + $0x50] sm:$0xff] }
 0x13d   : > { %v985_v35 = vsel %vm732_vm0, %v984_v34, 0.0  ;;  %v1891_v34 = vld [vmem:[%s2552_s14 + $0x48] sm:$0xff]  ;;  %1218 = vmatpush.msra.mxu2 %v1892_v32  ;;  %v2785_v32 = vld [vmem:[%s2729_s24 + $0x2] ss:$0 sm:$0xff] }
 0x13e   : > { %v986_v36 = vrot.slane %v985_v35, 4 }
 0x13f   : > { %1219 = vmatpush.msra.mxu2 %v1891_v34 }
 0x140   : > { %v987_v37 = vadd.f32 %v986_v36, %v985_v35  ;;  %v1103_v36 = vld [vmem:[#allocation4 + $0x8] sm:$0xff] }
 0x142   : > { %v988_v38 = vrot.slane %v987_v37, 2 }
 0x143   : > { %v2669_v39 = vld [vmem:[#allocation5] sm:$0xff] }
 0x144   : > { %v989_v40 = vadd.f32 %v988_v38, %v987_v37  ;;  %1874 = vmatmul.msk.f32.vlgmr.msrb.gmra.mxu1 %vm732_vm0, %v2669_v39  ;;  %1875 = vmatmul.msk.f32.vlgmr.msrb.gmra.mxu2 %vm732_vm0, %v2669_v39  ;;  %v1904_v37 = vld [vmem:[%s2555_s27 + $0x58] sm:$0xff]  ;;  %v1903_v38 = vld [vmem:[%s2555_s27 + $0x50] sm:$0xff] }
 0x145   : > { %1876 = vmatmul.msk.f32.vlgmr.msra.gmra.mxu3 %vm732_vm0, %v2669_v39  ;;  %1315 = vmatpush.msrb.mxu0 %v1904_v37 }
 0x146   : > { %v990_v17 = vrot.slane %v989_v40, 1  ;;  %1292 = vmatpush.msra.mxu3 %v1900_v9 }
 0x147   : > { %1316 = vmatpush.msrb.mxu0 %v1903_v38 }
 0x148   : > { %v991_v41 = vadd.f32 %v990_v17, %v989_v40  ;;  %1293 = vmatpush.msra.mxu3 %v1899_v15 }
 0x14a   : > { %993 = vst.msk [vmem:[#allocation6] sm:$0x1] %vm992_vm10, %v991_v41  ;;  %1294 = vmatpush.msra.mxu3 %v1898_v20  ;;  %v1890_v41 = vld [vmem:[%s2552_s14 + $0x40] sm:$0xff] }
 0x14b   : > { %1220 = vmatpush.msra.mxu2 %v1890_v41 }
 0x14c   : > { %1295 = vmatpush.msra.mxu3 %v1897_v21  ;;  %1895 = vmatmul.msk.f32.vlgmr.msra.gmra.mxu2 %vm732_vm0, %v2583_v11 }
 0x14d   : > { %1425 = vmatpush.msrb.mxu2 %v1900_v9 }
 0x14f   : > { %1426 = vmatpush.msrb.mxu2 %v1899_v15 }
 0x151   : > { %1427 = vmatpush.msrb.mxu2 %v1898_v20 }
 0x153   : > { %1428 = vmatpush.msrb.mxu2 %v1897_v21 }
 0x154   : > { %1896 = vmatmul.msk.f32.gmra.mxu2 %vm732_vm0, %v2621_v26 }
 0x1c1   : > { %v1015_v43 = vpop.f32.mrf.mxu1 }
 0x1c2   : > { %v1016_v44 = vadd.f32 %v2640_v33, %v1015_v43  ;;  %v1902_v43 = vld [vmem:[%s2555_s27 + $0x48] sm:$0xff] }
 0x1c3   : > { %1317 = vmatpush.msrb.mxu0 %v1902_v43 }
 0x1c4   : > { %v1060_v46 = vadd.f32 %v1059_v45, %v1016_v44 }
 0x1c6   : > { %v1877_v47 = vmul.f32 -1.442695, %v1060_v46  ;;  %v1901_v46 = vld [vmem:[%s2555_s27 + $0x40] sm:$0xff]  ;;  %s690_s27 = scalar_lea.vmem [#allocation18], %s1837_s11 }
 0x1c7   : > { %v1035_v48 = vpop.f32.mrf.mxu2  ;;  %1318 = vmatpush.msrb.mxu0 %v1901_v46  ;;  %s1595_s2 = sshll.u32 %s690_s27, 4  ;;  %s1596_s2 = int_to_ptr.vmem [resolvable:$true] %s1595_s2 }
 0x1c8   : > { %2036 = vpow2.f32 %v1877_v47  ;;  %v1036_v49 = vadd.f32 %v2647_v42, %v1035_v48  ;;  %v1886_v42 = vld [vmem:[%s2552_s14 + $0x38] sm:$0xff]  ;;  %v1055_v14 = vpop.f32.mrf.mxu3  ;;  %s1926_s14 = sshll.u32 %s2572_s21, 5 }
 0x1c9   : > { %1182 = vmatpush.msra.mxu1 %v1886_v42  ;;  %v1056_v23 = vadd.f32 %v2652_v57, %v1055_v14  ;;  %s711_s9 = scalar_lea.vmem %s2917_s20, %s1926_s14  ;;  %s716_s19 = scalar_lea.vmem %s2919_s17, %s1926_s14 }
 0x1ca   : > { %v1082_v52 = vadd.f32 %v1081_v50, %v1036_v49  ;;  %v2738_v49 = vstv %s1880_s23 }
 0x1cb   : > { %1183 = vmatpush.msra.mxu1 %v1885_v60  ;;  %vm1115_vm4 = vcmp.eq.s32.totalorder %v2657_v25, %v2738_v49  ;;  %v2025_v25 = vld [vmem:[%s719_s22] ss:$0 sm:$0xff]  ;;  %s2221_s22 = scalar_lea.hbm %s2920_s0, 4 }
 0x1cc   : > { %v1878_v54 = vmul.f32 -1.442695, %v1082_v52 }
 0x1cd   : > { %1184 = vmatpush.msra.mxu1 %v1884_v0 }
 0x1ce   : > { %v2037_v33 = vpop.eup %2036  ;;  %2038 = vpow2.f32 %v1878_v54 }
 0x1cf   : > { %v1064_v56 = vadd.f32 1.0, %v2037_v33  ;;  %1185 = vmatpush.msra.mxu1 %v1883_v3 }
 0x1d0   : > { %1888 = vmatmul.msk.f32.vlgmr.msra.gmra.mxu1 %vm732_vm0, %v2583_v11 }
 0x1d1   : > { %2040 = vrcp.f32 %v1064_v56  ;;  %1405 = vmatpush.msrb.mxu1 %v1233_v59  ;;  %v1076_v8 = vand.u32 2147483648, %v1064_v56  ;;  %v1074_v12 = vand.u32 2147483647, %v1064_v56  ;;  %vm1070_vm12 = vweird.f32 %v1064_v56  ;;  %v1152_v59 = vpop.f32.mrf.mxu0 }
 0x1d3   : > { %1406 = vmatpush.msrb.mxu1 %v1232_v63  ;;  %v1077_v19 = vor.u32 1.1754944e-38, %v1076_v8  ;;  %vm1075_vm14 = vcmp.eq.f32.partialorder %v1074_v12, 8.507059e+37 }
 0x1d4   : > { %v2039_v61 = vpop.eup %2038 }
 0x1d5   : > { %v2695_v62 = vadd.f32 1.0, %v2039_v61  ;;  %1407 = vmatpush.msrb.mxu1 %v1231_v2  ;;  %v2020_v61 = vld [vmem:[%s2682_s29 + $0x1] ss:$0 sm:$0xff] }
 0x1d7   : > { %v2041_v1 = vpop.eup %2040  ;;  %2042 = vrcp.f32 %v2695_v62  ;;  %1408 = vmatpush.msrb.mxu1 %v1230_v6  ;;  %v1098_v57 = vand.u32 2147483648, %v2695_v62  ;;  %vm1092_vm1 = vweird.f32 %v2695_v62  ;;  %v1096_v35 = vand.u32 2147483647, %v2695_v62  ;;  %v1222_v6 = vpop.f32.mrf.mxu2 }
 0x1d8   : > { %v1066_v5 = vmul.f32 %v2041_v1, %v1064_v56  ;;  %vm1071_vm11 = vweird.f32 %v2041_v1  ;;  %1889 = vmatmul.msk.f32.gmra.mxu1 %vm732_vm0, %v2621_v26 }
 0x1d9   : > { %vm1072_vm13 = vmor %vm1070_vm12, %vm1071_vm11  ;;  %v1099_v44 = vor.u32 1.1754944e-38, %v1098_v57  ;;  %vm1097_vm3 = vcmp.eq.f32.partialorder %v1096_v35, 8.507059e+37  ;;  %v1523_v35 = vld [vmem:[%s711_s9 + $0x18] sm:$0xff] }
 0x1da   : > { %v1067_v7 = vsub.f32 1.0, %v1066_v5  ;;  %v2023_v5 = vld [vmem:[%s2682_s29 + $0x2] ss:$0 sm:$0xff]  ;;  %1567 = vmatpush.msra.mxu1 %v1523_v35 }
 0x1dc   : > { %v1068_v10 = vmul.f32 %v2041_v1, %v1067_v7  ;;  %v1223_v7 = vadd.f32 %v2023_v5, %v1222_v6 }
 0x1dd   : > { %v2043_v13 = vpop.eup %2042 }
 0x1de   : > { %v1088_v16 = vmul.f32 %v2043_v13, %v2695_v62  ;;  %v1069_v18 = vadd.f32 %v2041_v1, %v1068_v10  ;;  %vm1093_vm15 = vweird.f32 %v2043_v13  ;;  %v1155_v62 = vpop.f32.mrf.mxu0  ;;  %1228 = vst.msk [vmem:[#allocation4] sm:$0xff] %vm732_vm0, %v1223_v7  ;;  %v2771_v10 = vld [vmem:[%s2729_s24] ss:$0 sm:$0xff] }
 0x1df   : > { %vm1094_vm2 = vmor %vm1092_vm1, %vm1093_vm15  ;;  %v1225_v8 = vpop.f32.mrf.mxu2 }
 0x1e0   : > { %v1089_v22 = vsub.f32 1.0, %v1088_v16  ;;  %v1073_v24 = vsel %vm1072_vm13, %v2041_v1, %v1069_v18  ;;  %v1226_v9 = vadd.f32 %v2023_v5, %v1225_v8  ;;  %v2775_v18 = vld [vmem:[%s2729_s24 + $0x1] ss:$0 sm:$0xff] }
 0x1e1   : > { %v1078_v29 = vsel %vm1075_vm14, %v1077_v19, %v1073_v24 }
 0x1e2   : > { %v1090_v30 = vmul.f32 %v2043_v13, %v1089_v22  ;;  %v1104_v31 = vmul.f32 %v1078_v29, %v1056_v23  ;;  %1229 = vst.msk [vmem:[#allocation4 + $0x8] sm:$0xff] %vm732_vm0, %v1226_v9 }
 0x1e4   : > { %v1091_v40 = vadd.f32 %v2043_v13, %v1090_v30  ;;  %v1105_v17 = vadd.f32 %v1104_v31, %v1103_v36 }
 0x1e6   : > { %v1095_v45 = vsel %vm1094_vm2, %v2043_v13, %v1091_v40  ;;  %2044 = vtanh.f32 %v1105_v17  ;;  %v1522_v17 = vld [vmem:[%s711_s9 + $0x10] sm:$0xff] }
 0x1e7   : > { %v1100_v47 = vsel %vm1097_vm3, %v1099_v44, %v1095_v45  ;;  %1568 = vmatpush.msra.mxu1 %v1522_v17  ;;  %v1521_v44 = vld [vmem:[%s711_s9 + $0x8] sm:$0xff]  ;;  %v1528_v17 = vld [vmem:[%s716_s19 + $0x18] sm:$0xff] }
 0x1e8   : > { %v1107_v48 = vsub.f32 1.0, %v1100_v47  ;;  %v1109_v52 = vmul.f32 %v1100_v47, %v2669_v39  ;;  %v1520_v47 = vld [vmem:[%s711_s9] sm:$0xff]  ;;  %1544 = vmatpush.msra.mxu0 %v1528_v17 }
 0x1e9   : > { %1569 = vmatpush.msra.mxu1 %v1521_v44 }
 0x1eb   : > { %1570 = vmatpush.msra.mxu1 %v1520_v47  ;;  %v1526_v47 = vld [vmem:[%s716_s19 + $0x8] sm:$0xff] }
 0x1ec   : > { %v2045_v50 = vpop.eup %2044 }
 0x1ed   : > { %v1108_v51 = vmul.f32 %v2045_v50, %v1107_v48 }
 0x1ef   : > { %v1110_v53 = vadd.f32 %v1109_v52, %v1108_v51  ;;  %v1365_v52 = vld [vmem:[#allocation4 + $0x8] sm:$0xff] }
 0x1f1   : > { %1111 = vst.msk [vmem:[#allocation5] sm:$0xff] %vm732_vm0, %v1110_v53  ;;  %v1118_v11 = vsel %vm1115_vm4, %v1110_v53, 0.0 }
 0x1f2   : > { %v1119_v54 = vsel %vm732_vm0, %v1118_v11, 0.0  ;;  %1249 = vst.msk [vmem:[#allocation5] sm:$0xff] %vm732_vm0, %v2284_v4  ;;  %v2019_v4 = vld [vmem:[%s2682_s29] ss:$0 sm:$0xff]  ;;  %s1923_s29 = sshll.u32 %s2431_s13, 1  ;;  %s1583_s13 = scalar_lea.sflag [#allocation10], %s2535_s16 }
 0x1f3   : > { %v1120_v39 = vrot.slane %v1119_v54, 4  ;;  %v1153_v60 = vadd.f32 %v2019_v4, %v1152_v59  ;;  %v1156_v0 = vadd.f32 %v2019_v4, %v1155_v62  ;;  %s1593_s28 = scalar_lea.hbm %s2920_s0, %s1923_s29 }
 0x1f4   : > { %s1597_s20 = sshll.u32 %s1593_s28, 4  ;;  %s1598_s20 = int_to_ptr.hbm [resolvable:$true] %s1597_s20 }
 0x1f5   : > { %v1121_v55 = vadd.f32 %v1120_v39, %v1119_v54  ;;  %1158 = vst.msk [vmem:[#allocation2] sm:$0xff] %vm732_vm0, %v1153_v60  ;;  %s2215_s9 = sshra.s32 %s1598_s20, 4  ;;  %s2216_s9 = int_to_ptr.hbm [resolvable:$true] %s2215_s9 }
 0x1f6   : > { %1159 = vst.msk [vmem:[#allocation2 + $0x8] sm:$0xff] %vm732_vm0, %v1156_v0  ;;  %s2217_s10 = scalar_lea.hbm %s2216_s9, 2  ;;  %p2222_p1 = scmp.lt.s32.totalorder %s2216_s9, %s2920_s0 }
 0x1f7   : > { %v1122_v33 = vrot.slane %v1121_v55, 2  ;;  %p2218_p8 = scmp.ne.s32.totalorder %s2216_s9, %s2217_s10  ;;  %p2223_p5 = scmp.lt.s32.totalorder %s2221_s22, %s2217_s10 }
 0x1f9   : > { %v1123_v56 = vadd.f32 %v1122_v33, %v1121_v55  ;;  %v2752_v58 = vld [vmem:[#allocation5] sm:$0xff]  ;;  %p2219_p4 = pnand %p2218_p8, %p2448_p11  ;;  %p2224_p3 = por %p2223_p5, %p2222_p1 }
 0x1fa   : > { %1907 = vmatmul.msk.f32.vlgmr.msrb.gmra.mxu3 %vm732_vm0, %v2752_v58  ;;  %1909 = vmatmul.msk.f32.vlgmr.msrb.gmra.mxu0 %vm732_vm0, %v2752_v58 }
 0x1fb   : > { %v1124_v26 = vrot.slane %v1123_v56, 1  ;;  %1445 = vmatpush.msrb.mxu3 %v1904_v37  ;;  %p2220_p9 = pneg %p2219_p4 }
 0x1fd   : > { %v1125_v42 = vadd.f32 %v1124_v26, %v1123_v56  ;;  %1446 = vmatpush.msrb.mxu3 %v1903_v38  ;;  %v1323_v13 = vld [vmem:[#allocation2 + $0x8] sm:$0xff]  ;;  %p2225_p7 = pnand %p2224_p3, %p2220_p9 }
 0x1ff   : > { %1126 = vst.msk [vmem:[#allocation6 + $0x1] sm:$0x1] %vm992_vm10, %v1125_v42  ;;  %1447 = vmatpush.msrb.mxu3 %v1902_v43 }
 0x201   : > { %1448 = vmatpush.msrb.mxu3 %v1901_v46 }
 0x202   : > { %1908 = vmatmul.msk.f32.vlgmr.msra.gmra.mxu3 %vm732_vm0, %v2752_v58 }
 0x206   : > { %v1519_v8 = vld [vmem:[#allocation6] sm:$0x3] }
 0x24d   : > { %v1187_v63 = vpop.f32.mrf.mxu1 }
 0x24e   : > { %v1188_v1 = vadd.f32 %v2020_v61, %v1187_v63 }
 0x250   : > { %1193 = vst.msk [vmem:[#allocation3] sm:$0xff] %vm732_vm0, %v1188_v1 }
 0x255   : > { %v1190_v2 = vpop.f32.mrf.mxu1 }
 0x256   : > { %v1191_v3 = vadd.f32 %v2020_v61, %v1190_v2 }
 0x258   : > { %1194 = vst.msk [vmem:[#allocation3 + $0x8] sm:$0xff] %vm732_vm0, %v1191_v3 }
 0x25f   : > { %v1344_v20 = vld [vmem:[#allocation3 + $0x8] sm:$0xff] }
 0x277   : > { %v1320_v36 = vpop.f32.mrf.mxu0 }
 0x278   : > { %v1321_v41 = vadd.f32 %v2785_v32, %v1320_v36 }
 0x27d   : > { %v1274_v12 = vpop.f32.mrf.mxu3 }
 0x27e   : > { %v1275_v14 = vadd.f32 %v2771_v10, %v1274_v12 }
 0x280   : > { %v1324_v15 = vadd.f32 %v1323_v13, %v1275_v14  ;;  %v1453_v13 = vld [vmem:[#allocation2] sm:$0xff] }
 0x282   : > { %v1910_v16 = vmul.f32 -1.442695, %v1324_v15 }
 0x284   : > { %2046 = vpow2.f32 %v1910_v16 }
 0x285   : > { %v1297_v19 = vpop.f32.mrf.mxu3 }
 0x286   : > { %v1298_v21 = vadd.f32 %v2775_v18, %v1297_v19 }
 0x288   : > { %v1345_v22 = vadd.f32 %v1344_v20, %v1298_v21  ;;  %v1474_v20 = vld [vmem:[#allocation3] sm:$0xff] }
 0x28a   : > { %v2047_v23 = vpop.eup %2046  ;;  %v1911_v24 = vmul.f32 -1.442695, %v1345_v22 }
 0x28b   : > { %v1328_v27 = vadd.f32 1.0, %v2047_v23 }
 0x28c   : > { %2048 = vpow2.f32 %v1911_v24 }
 0x28d   : > { %2050 = vrcp.f32 %v1328_v27  ;;  %v1340_v37 = vand.u32 2147483648, %v1328_v27  ;;  %v1338_v40 = vand.u32 2147483647, %v1328_v27  ;;  %vm1334_vm6 = vweird.f32 %v1328_v27 }
 0x28f   : > { %v1341_v46 = vor.u32 1.1754944e-38, %v1340_v37  ;;  %vm1339_vm8 = vcmp.eq.f32.partialorder %v1338_v40, 8.507059e+37 }
 0x292   : > { %v2049_v29 = vpop.eup %2048 }
 0x293   : > { %v2051_v30 = vpop.eup %2050  ;;  %v1349_v57 = vadd.f32 1.0, %v2049_v29 }
 0x294   : > { %v1330_v31 = vmul.f32 %v2051_v30, %v1328_v27  ;;  %vm1335_vm5 = vweird.f32 %v2051_v30 }
 0x295   : > { %2052 = vrcp.f32 %v1349_v57  ;;  %vm1336_vm7 = vmor %vm1334_vm6, %vm1335_vm5  ;;  %v1361_v54 = vand.u32 2147483648, %v1349_v57  ;;  %v1359_v55 = vand.u32 2147483647, %v1349_v57  ;;  %vm1355_vm12 = vweird.f32 %v1349_v57 }
 0x296   : > { %v1331_v34 = vsub.f32 1.0, %v1330_v31 }
 0x297   : > { %v1362_v26 = vor.u32 1.1754944e-38, %v1361_v54  ;;  %vm1360_vm14 = vcmp.eq.f32.partialorder %v1359_v55, 8.507059e+37 }
 0x298   : > { %v1332_v38 = vmul.f32 %v2051_v30, %v1331_v34 }
 0x29a   : > { %v1333_v43 = vadd.f32 %v2051_v30, %v1332_v38 }
 0x29b   : > { %v2053_v45 = vpop.eup %2052 }
 0x29c   : > { %v1351_v48 = vmul.f32 %v2053_v45, %v1349_v57  ;;  %v1337_v50 = vsel %vm1336_vm7, %v2051_v30, %v1333_v43  ;;  %vm1356_vm11 = vweird.f32 %v2053_v45 }
 0x29d   : > { %v1342_v51 = vsel %vm1339_vm8, %v1341_v46, %v1337_v50  ;;  %vm1357_vm13 = vmor %vm1355_vm12, %vm1356_vm11 }
 0x29e   : > { %v1352_v53 = vsub.f32 1.0, %v1351_v48  ;;  %v1366_v11 = vmul.f32 %v1342_v51, %v1321_v41  ;;  %v1527_v41 = vld [vmem:[%s716_s19 + $0x10] sm:$0xff] }
 0x29f   : > { %1545 = vmatpush.msra.mxu0 %v1527_v41 }
 0x2a0   : > { %v1353_v39 = vmul.f32 %v2053_v45, %v1352_v53  ;;  %v1367_v33 = vadd.f32 %v1366_v11, %v1365_v52  ;;  %v1495_v53 = vld [vmem:[#allocation4] sm:$0xff] }
 0x2a1   : > { %v1525_v11 = vld [vmem:[%s716_s19] sm:$0xff]  ;;  %1546 = vmatpush.msra.mxu0 %v1526_v47 }
 0x2a2   : > { %v1354_v56 = vadd.f32 %v2053_v45, %v1353_v39  ;;  %2054 = vtanh.f32 %v1367_v33 }
 0x2a3   : > { %1547 = vmatpush.msra.mxu0 %v1525_v11 }
 0x2a4   : > { %v1358_v42 = vsel %vm1357_vm13, %v2053_v45, %v1354_v56 }
 0x2a5   : > { %v1363_v4 = vsel %vm1360_vm14, %v1362_v26, %v1358_v42 }
 0x2a6   : > { %v1369_v59 = vsub.f32 1.0, %v1363_v4  ;;  %v1371_v62 = vmul.f32 %v1363_v4, %v2752_v58 }
 0x2a8   : > { %v2055_v60 = vpop.eup %2054 }
 0x2a9   : > { %v1370_v61 = vmul.f32 %v2055_v60, %v1369_v59 }
 0x2ab   : > { %v1372_v63 = vadd.f32 %v1371_v62, %v1370_v61 }
 0x2ad   : > { %1373 = vst.msk [vmem:[#allocation5] sm:$0xff] %vm732_vm0, %v1372_v63  ;;  %v1380_v0 = vsel %vm1115_vm4, %v1372_v63, 0.0 }
 0x2ae   : > { %v1381_v1 = vsel %vm732_vm0, %v1380_v0, 0.0 }
 0x2af   : > { %v1382_v2 = vrot.slane %v1381_v1, 4 }
 0x2b1   : > { %v1383_v3 = vadd.f32 %v1382_v2, %v1381_v1 }
 0x2b3   : > { %v1384_v5 = vrot.slane %v1383_v3, 2 }
 0x2b4   : > { %v2794_v6 = vld [vmem:[#allocation5] sm:$0xff] }
 0x2b5   : > { %v1385_v7 = vadd.f32 %v1384_v5, %v1383_v3  ;;  %1914 = vmatmul.msk.f32.vlgmr.msrb.gmra.mxu1 %vm732_vm0, %v2794_v6  ;;  %1915 = vmatmul.msk.f32.vlgmr.msrb.gmra.mxu2 %vm732_vm0, %v2794_v6 }
 0x2b6   : > { %1916 = vmatmul.msk.f32.vlgmr.msrb.gmra.mxu3 %vm732_vm0, %v2794_v6 }
 0x2b7   : > { %v1386_v49 = vrot.slane %v1385_v7, 1 }
 0x2b9   : > { %v1387_v58 = vadd.f32 %v1386_v49, %v1385_v7 }
 0x2bb   : > { %1388 = vst.msk [vmem:[#allocation7 + $0x1] sm:$0x1] %vm992_vm10, %v1387_v58 }
 0x2bd   : > { %1921 = vmatmul.msk.f32.vlgmr.msra.gmra.mxu1 %vm732_vm0, %v1519_v8 }
 0x332   : > { %v1410_v9 = vpop.f32.mrf.mxu1 }
 0x333   : > { %v1411_v12 = vadd.f32 %v2771_v10, %v1410_v9 }
 0x335   : > { %v1454_v14 = vadd.f32 %v1453_v13, %v1411_v12 }
 0x337   : > { %v1917_v15 = vmul.f32 -1.442695, %v1454_v14 }
 0x338   : > { %v1430_v16 = vpop.f32.mrf.mxu2 }
 0x339   : > { %2056 = vpow2.f32 %v1917_v15  ;;  %v1431_v19 = vadd.f32 %v2775_v18, %v1430_v16  ;;  %v1450_v36 = vpop.f32.mrf.mxu3 }
 0x33a   : > { %v1451_v44 = vadd.f32 %v2785_v32, %v1450_v36  ;;  %v1572_v28 = vpop.f32.mrf.mxu1 }
 0x33b   : > { %v1475_v21 = vadd.f32 %v1474_v20, %v1431_v19 }
 0x33d   : > { %v1918_v22 = vmul.f32 -1.442695, %v1475_v21 }
 0x33f   : > { %v2057_v23 = vpop.eup %2056  ;;  %2058 = vpow2.f32 %v1918_v22 }
 0x340   : > { %v1458_v24 = vadd.f32 1.0, %v2057_v23 }
 0x342   : > { %2060 = vrcp.f32 %v1458_v24  ;;  %v1470_v31 = vand.u32 2147483648, %v1458_v24  ;;  %v1468_v35 = vand.u32 2147483647, %v1458_v24  ;;  %vm1464_vm1 = vweird.f32 %v1458_v24 }
 0x344   : > { %v1471_v40 = vor.u32 1.1754944e-38, %v1470_v31  ;;  %vm1469_vm3 = vcmp.eq.f32.partialorder %v1468_v35, 8.507059e+37 }
 0x345   : > { %v2059_v27 = vpop.eup %2058 }
 0x346   : > { %v1479_v29 = vadd.f32 1.0, %v2059_v27 }
 0x348   : > { %v2061_v30 = vpop.eup %2060  ;;  %2062 = vrcp.f32 %v1479_v29  ;;  %v1491_v50 = vand.u32 2147483648, %v1479_v29  ;;  %v1489_v52 = vand.u32 2147483647, %v1479_v29  ;;  %vm1485_vm5 = vweird.f32 %v1479_v29 }
 0x349   : > { %v1460_v10 = vmul.f32 %v2061_v30, %v1458_v24  ;;  %vm1465_vm15 = vweird.f32 %v2061_v30 }
 0x34a   : > { %vm1466_vm2 = vmor %vm1464_vm1, %vm1465_vm15  ;;  %v1492_v55 = vor.u32 1.1754944e-38, %v1491_v50  ;;  %vm1490_vm7 = vcmp.eq.f32.partialorder %v1489_v52, 8.507059e+37 }
 0x34b   : > { %v1461_v57 = vsub.f32 1.0, %v1460_v10 }
 0x34d   : > { %v1462_v34 = vmul.f32 %v2061_v30, %v1461_v57 }
 0x34e   : > { %v2063_v18 = vpop.eup %2062 }
 0x34f   : > { %v1481_v37 = vmul.f32 %v2063_v18, %v1479_v29  ;;  %v1463_v38 = vadd.f32 %v2061_v30, %v1462_v34  ;;  %vm1486_vm4 = vweird.f32 %v2063_v18 }
 0x350   : > { %vm1487_vm6 = vmor %vm1485_vm5, %vm1486_vm4 }
 0x351   : > { %v1482_v43 = vsub.f32 1.0, %v1481_v37  ;;  %v1467_v45 = vsel %vm1466_vm2, %v2061_v30, %v1463_v38 }
 0x352   : > { %v1472_v46 = vsel %vm1469_vm3, %v1471_v40, %v1467_v45 }
 0x353   : > { %v1483_v48 = vmul.f32 %v2063_v18, %v1482_v43  ;;  %v1496_v51 = vmul.f32 %v1472_v46, %v1451_v44 }
 0x355   : > { %v1484_v54 = vadd.f32 %v2063_v18, %v1483_v48  ;;  %v1497_v39 = vadd.f32 %v1496_v51, %v1495_v53 }
 0x357   : > { %v1488_v32 = vsel %vm1487_vm6, %v2063_v18, %v1484_v54  ;;  %2064 = vtanh.f32 %v1497_v39 }
 0x358   : > { %v1493_v33 = vsel %vm1490_vm7, %v1492_v55, %v1488_v32 }
 0x359   : > { %v1499_v56 = vsub.f32 1.0, %v1493_v33  ;;  %v1501_v4 = vmul.f32 %v1493_v33, %v2794_v6 }
 0x35d   : > { %v2065_v26 = vpop.eup %2064 }
 0x35e   : > { %v1500_v42 = vmul.f32 %v2065_v26, %v1499_v56 }
 0x360   : > { %v1502_v59 = vadd.f32 %v1501_v4, %v1500_v42 }
 0x362   : > { %1503 = vst.msk [vmem:[#allocation5] sm:$0xff] %vm732_vm0, %v1502_v59  ;;  %v1510_v60 = vsel %vm981_vm9, %v1502_v59, 0.0 }
 0x363   : > { %v1511_v61 = vsel %vm732_vm0, %v1510_v60, 0.0 }
 0x364   : > { %v1512_v62 = vrot.slane %v1511_v61, 4 }
 0x366   : > { %v1513_v63 = vadd.f32 %v1512_v62, %v1511_v61 }
 0x368   : > { %v1514_v0 = vrot.slane %v1513_v63, 2 }
 0x36a   : > { %v1515_v1 = vadd.f32 %v1514_v0, %v1513_v63 }
 0x36c   : > { %v1516_v2 = vrot.slane %v1515_v1, 1 }
 0x36e   : > { %v1517_v3 = vadd.f32 %v1516_v2, %v1515_v1 }
 0x370   : > { %1518 = vst.msk [vmem:[#allocation7] sm:$0x1] %vm992_vm10, %v1517_v3 }
 0x377   : > { %v1524_v5 = vld [vmem:[#allocation7] sm:$0x3] }
 0x378   : > { %1920 = vmatmul.msk.f32.vlgmr.msra.gmra.mxu0 %vm732_vm0, %v1524_v5  ;;  %vm1580_vm0 = vcmask 123904  }
 0x3f5   : > { %v1549_v6 = vpop.f32.mrf.mxu0 }
 0x3f6   : > { %v1573_v7 = vadd.f32 %v1572_v28, %v1549_v6 }
 0x3f8   : > { %v1579_v49 = vadd.f32 %v2025_v25, %v1573_v7 }
 0x3fa   : > { %1581 = vst.msk [vmem:[%s690_s27] sm:$0x3] %vm1580_vm0, %v1579_v49 }
 0x3fb   : > { %2228 = shalt.err (!%p2225_p7)
}
 0x3fc   : > { %1950 = dma.vmem_to_hbm [thread:$0]  (%p2448_p11), %s1596_s2, 32, %s1598_s20, %s1583_s13  }
 0x3fd PF: > { %s2922_s16 = sld [smem:[#allocation24_spill]] }
 0x3fe   : > { %s2924_s19 = sld [smem:[#allocation26_spill]] }
 0x403   : > { %s1609_s11 = sand.u32 1, %s2922_s16  }
 0x404   : > { %p2925_p10 = scmp.ge.s32.totalorder %s2924_s19, 2  ;;  %s1610_s29 = scalar_lea.sflag [#allocation10], %s1609_s11 }
 0x406   : > { %p1970_p13 = pnand %p2925_p10, %p2452_p12 }
 0x408   : > { %p1971_p0 = pneg %p1970_p13 }
 0x40a   : > { %2262 = dma.done.wait (%p1971_p0), %s1610_s29, 32  }
 0x40b   : > { %2264 = vsyncadd (%p1971_p0), %s1610_s29, 4294967264  ;;  %s2926_s28 = sld [smem:[#allocation27_spill]]  ;;  %s2929_s25 = smov %s2271_s26 }
 0x40c   : > { %s2927_s30 = sld [smem:[#allocation25_spill]] }
 0x40d   : > { %s2928_s27 = sld [smem:[#allocation28_spill]] }
 0x411   : > { %p33_p2 = scmp.ge.s32.totalorder %s2926_s28, 4  }
 0x412   : > { %s2930_s26 = smov %s2927_s30 }
 0x413   :  { %35 = sbr.rel (!%p33_p2) target bundleno = 19 (0x13), region = 199 }
 0x418   :  { %1616 = vsyncpa [#allocation9], 1 }
 0x419   :  { %1618 = vsyncpa [#allocation9 + $0x1], 1 }
 0x41a   :  { %1619 = vsyncpa [#allocation14], 1 }
 0x41b   :  { %1621 = vsyncpa [#allocation14 + $0x1], 1 }
 0x41c   :  { %1622 = vsyncpa [#allocation17], 1 }
 0x41d   :  { %1624 = vsyncpa [#allocation17 + $0x1], 1 }
 0x41e   :  { %1625 = vsyncpa [#allocation10], 1 }
 0x41f   :  { %1627 = vsyncpa [#allocation10 + $0x1], 1 }
 0x420   :  { %1628 = vsyncpa [#allocation11], 1 }
 0x421   :  { %1630 = vsyncpa [#allocation11 + $0x1], 1 }

</bundles_post_ra>
